<compile_context>
chip_gen: v6e
topology: v6e:2x2x1
jax: 0.10.0
libtpu: 0.0.40
codegen_flags: <defaults>
</compile_context>

<pallas_src>
import functools

import numpy as np
import jax
import jax.numpy as jnp
from jax.experimental import pallas as pl
from jax.experimental.pallas import tpu as pltpu

NEG_MAX = float(-jnp.finfo(jnp.float32).max)   # -torch.finfo(float32).max
LN_EPS = 1e-5                                  # PyTorch LayerNorm default eps


def _layer_norm(x, gamma, beta):
    mu = jnp.mean(x, axis=-1, keepdims=True)
    var = jnp.mean((x - mu) ** 2, axis=-1, keepdims=True)
    return (x - mu) * jax.lax.rsqrt(var + LN_EPS) * gamma + beta


# -----------------------------------------------------------------------------
# Fused Pallas kernel: grid = (batch blocks, layers). One grid step = one full
# EncoderLayer applied to Bt batch elements. The running activation lives in
# out_ref; `prev` lives in VMEM scratch across the layer axis.
# -----------------------------------------------------------------------------
def fused_encoder_kernel(
    x_ref,
    wq_ref, wk_ref, wv_ref, wo_ref,
    wcirc_ref,
    w1_ref, w2_ref,
    vec_ref, b1_ref, epm_b2d_ref,
    out_ref,
    prev_scr,
    *, Bt, S, D, dk, heads, dh, scale):
    layer = pl.program_id(1)

    @pl.when(layer == 0)
    def _init():
        out_ref[...] = x_ref[...]                    # layer-0 input
        prev_scr[...] = jnp.zeros_like(prev_scr)     # prev=None <=> add zeros

    x3 = out_ref[...]                                # (Bt, S, D) f32, running act
    prev = prev_scr[...]                             # (Bt, S, S) f32
    x2 = x3.reshape(Bt * S, D)                       # flattened batch-independent slab
    x_bf = x2.astype(jnp.bfloat16)

    vec = vec_ref[0]                                 # (6, D) packed small params
    bo, b2 = vec[0:1, :], vec[1:2, :]
    ln1_g, ln1_b = vec[2:3, :], vec[3:4, :]
    ln2_g, ln2_b = vec[4:5, :], vec[5:6, :]

    # ---------------- Attention (causal) --------------------------------------
    q = jnp.dot(x_bf, wq_ref[0], preferred_element_type=jnp.float32)   # (Bt*S, dk)
    k = jnp.dot(x_bf, wk_ref[0], preferred_element_type=jnp.float32)
    v = jnp.dot(x_bf, wv_ref[0], preferred_element_type=jnp.float32)
    q3 = q.reshape(Bt, S, dk).astype(jnp.bfloat16)
    k3 = k.reshape(Bt, S, dk).astype(jnp.bfloat16)
    v3 = v.reshape(Bt, S, dk).astype(jnp.bfloat16)

    sim = jnp.einsum('bid,bjd->bij', q3, k3,
                     preferred_element_type=jnp.float32) * scale + prev   # (Bt,S,S)

    row = jax.lax.broadcasted_iota(jnp.int32, (S, S), 0)
    col = jax.lax.broadcasted_iota(jnp.int32, (S, S), 1)
    causal = (col > row)[None]                       # (1, S, S), broadcasts over Bt

    # Next-layer prev: zeros at masked positions (equivalent to the PyTorch -max
    # carry — those entries are re-masked before softmax — and avoids -inf).
    prev_scr[...] = jnp.where(causal, 0.0, sim)

    sim = jnp.where(causal, NEG_MAX, sim)            # masked_fill_ before softmax
    m = jnp.max(sim, axis=-1, keepdims=True)
    e = jnp.exp(sim - m)
    attn = e * pl.reciprocal(jnp.sum(e, axis=-1, keepdims=True), approx=True)
    att_out = jnp.einsum('bij,bjd->bid', attn.astype(jnp.bfloat16), v3,
                         preferred_element_type=jnp.float32)              # (Bt,S,dk)
    gate_res = jnp.dot(att_out.reshape(Bt * S, dk).astype(jnp.bfloat16),
                       wo_ref[0], preferred_element_type=jnp.float32) + bo  # (Bt*S,D)

    # ---------------- EPM: circulant spatial gating (act = Identity) ----------
    res = x2
    gate = _layer_norm(x2, ln1_g, ln1_b)                                  # (Bt*S, D)
    gate3 = gate.reshape(Bt, S, D).astype(jnp.bfloat16)                   # major split
    wc = wcirc_ref[0]                                                     # (h, S, S) bf16

    # Per head: one batched matmul over ALL Bt at once (no per-batch slicing).
    outs = []
    for hh in range(heads):
        w_h = jnp.broadcast_to(wc[hh][None], (Bt, S, S))                  # (Bt,S,S)
        g_h = gate3[:, :, hh * dh:(hh + 1) * dh]                          # (Bt,S,dh)
        outs.append(jnp.einsum('bmn,bnd->bmd', w_h, g_h,
                               preferred_element_type=jnp.float32))
    gate2 = outs[0] if heads == 1 else jnp.concatenate(outs, axis=-1)     # (Bt,S,D)
    gate2 = gate2 + epm_b2d_ref[0][None]                                  # + bias(h,n)
    gate2 = gate2.reshape(Bt * S, D) + gate_res
    att = gate2 * res

    # ---------------- PositionWiseFeedForward ---------------------------------
    # TODO(synk): PositionWiseFeedForward source not provided; using the standard
    # (M2-Transformer) fc1 -> ReLU -> fc2, residual, LayerNorm; dropout = identity.
    h1 = jnp.maximum(
        jnp.dot(att.astype(jnp.bfloat16), w1_ref[0],
                preferred_element_type=jnp.float32) + b1_ref[0], 0.0)
    ff = jnp.dot(h1.astype(jnp.bfloat16), w2_ref[0],
                 preferred_element_type=jnp.float32) + b2
    y = _layer_norm(att + ff, ln2_g, ln2_b)                               # (Bt*S, D)

    out_ref[...] = y.reshape(Bt, S, D)               # carried to next layer; HBM
                                                     # writeback only when the
                                                     # batch block changes.


# -----------------------------------------------------------------------------
# Generation-aware sizing helpers.
# -----------------------------------------------------------------------------
def _vmem_capacity_bytes():
    try:
        cap = int(pltpu.get_tpu_info().vmem_capacity_bytes)
        if cap > 0:
            return cap
    except Exception:
        pass
    return 64 * 1024 * 1024   # conservative (v7x-sized) fallback


def _per_layer_weight_bytes(S, D, dk, heads, d_ff):
    mxu = (3 * D * dk + dk * D + heads * S * S + 2 * D * d_ff) * 2   # bf16
    small = (6 * D + d_ff + S * D) * 4                               # f32
    return mxu + small


def _select_block_b(B, S, D, dk, heads, d_ff, vmem_cap):
    """Largest divisor Bt of B fitting the VMEM budget / MXU row target."""
    w_bytes = _per_layer_weight_bytes(S, D, dk, heads, d_ff)
    budget = int(0.70 * vmem_cap)
    two_core = vmem_cap <= 64 * 1024 * 1024          # v7x-class part: 2 TCs, 64 MiB
    best = 1
    for bt in range(1, B + 1):
        if B % bt:
            continue
        if bt * S > 1024:                            # taller buys nothing on the MXU
            continue
        if two_core and B >= 2 and B // bt < 2:      # keep both TensorCores busy
            continue
        act = bt * S * D * 4
        est = (bt * S * S * 4                        # prev carry scratch
               + 4 * act                             # x + out blocks (double-buffered)
               + 2 * w_bytes                         # double-buffered layer weights
               + 8 * act                             # f32 intermediates
               + 2 * bt * S * d_ff * 4               # FFN hidden
               + 3 * bt * S * S * 4)                 # sim / attn temporaries
        if est <= budget:
            best = bt
    return best


def multi_level_encoder(x, layer_params, padding_idx, *, heads, dk, block_b=None):
    """Pallas forward of MultiLevelEncoder. Returns (out, attention_mask)."""
    B, S, D = x.shape
    assert D % heads == 0
    dh = D // heads
    n_layers = len(layer_params)
    d_ff = layer_params[0]['w1'].shape[1]

    # Matches the PyTorch module; never consumed by the layers (as in the source).
    attention_mask = (jnp.sum(x, axis=-1) == padding_idx)[:, None, None, :]

    vmem_cap = _vmem_capacity_bytes()
    Bt = block_b if block_b is not None else _select_block_b(
        B, S, D, dk, heads, d_ff, vmem_cap)
    assert B % Bt == 0

    bf = jnp.bfloat16

    def stack(name, dtype=None):
        a = jnp.stack([p[name] for p in layer_params])   # leading layer axis
        return a.astype(dtype) if dtype is not None else a

    # Pack the six (1, D) small params per layer into one (6, D) tensor.
    vecs = jnp.stack([
        jnp.concatenate([p['bo'], p['b2'], p['ln1_g'], p['ln1_b'],
                         p['ln2_g'], p['ln2_b']], axis=0)
        for p in layer_params])                                      # (N, 6, D) f32

    params = [
        stack('wq', bf), stack('wk', bf), stack('wv', bf), stack('wo', bf),
        stack('wcirc', bf),
        stack('w1', bf), stack('w2', bf),
        vecs, stack('b1'), stack('epm_b2d'),
    ]

    def layer_spec(a):
        nd = a.ndim
        return pl.BlockSpec((1,) + a.shape[1:],
                            lambda b, l, _nd=nd: (l,) + (0,) * (_nd - 1))

    in_specs = [pl.BlockSpec((Bt, S, D), lambda b, l: (b, 0, 0))]
    in_specs += [layer_spec(a) for a in params]
    out_specs = pl.BlockSpec((Bt, S, D), lambda b, l: (b, 0, 0))

    kernel = functools.partial(
        fused_encoder_kernel, Bt=Bt, S=S, D=D, dk=dk, heads=heads, dh=dh,
        scale=float(dk) ** (-0.5))

    # Advisory cost estimate for XLA's scheduler.
    per_elem_flops = (2 * S * D * 3 * dk        # q/k/v projections
                      + 2 * S * S * dk * 2      # q·k^T and attn·v
                      + 2 * S * dk * D          # out projection
                      + 2 * S * S * D           # EPM circulant gating
                      + 2 * S * D * d_ff * 2)   # FFN
    w_bytes = _per_layer_weight_bytes(S, D, dk, heads, d_ff)
    cost = pl.CostEstimate(
        flops=int(per_elem_flops * B * n_layers),
        transcendentals=int(B * S * S * n_layers),
        bytes_accessed=int(2 * B * S * D * 4 + (B // Bt) * n_layers * w_bytes))

    vmem_limit = max(32 * 1024 * 1024,
                     min(int(vmem_cap * 0.85), 112 * 1024 * 1024))

    out = pl.pallas_call(
        kernel,
        grid=(B // Bt, n_layers),
        in_specs=in_specs,
        out_specs=out_specs,
        out_shape=jax.ShapeDtypeStruct((B, S, D), jnp.float32),
        scratch_shapes=[pltpu.VMEM((Bt, S, S), jnp.float32)],   # prev logits carry
        compiler_params=pltpu.CompilerParams(
            dimension_semantics=("parallel", "arbitrary"),
            vmem_limit_bytes=vmem_limit),
        cost_estimate=cost,
    )(x, *params)
    return out, attention_mask


# -----------------------------------------------------------------------------
# Parameter construction (glue, plain JAX) — deterministic, synthetic weights.
# -----------------------------------------------------------------------------
def build_circulant(w_seed, pos_x, pos_y, n):
    """Replicates EPM's pad/repeat/reshape circulant construction + causal mask."""
    h, ds = w_seed.shape
    i = jnp.arange(ds)[:, None]
    j = jnp.arange(ds)[None, :]
    idx = j - i + ds - 1                       # padded index (always >= 0 here)
    valid = idx < ds                           # >= ds hits the zero padding
    idx_c = jnp.clip(idx, 0, ds - 1)
    W = jnp.where(valid[None], w_seed[:, idx_c], 0.0)          # (h, ds, ds)
    W = W * pos_x[:, :, None] * pos_y[:, None, :]
    W = W[:, :n, :n]
    causal = jnp.triu(jnp.ones((n, n), bool), 1)
    return jnp.where(causal[None], 0.0, W)                      # (h, n, n)


def init_params(key, N, d_model, d_k, heads, d_ff, dim_seq, S):
    dh = d_model // heads
    layers = []
    for lkey in jax.random.split(key, N):
        k = jax.random.split(lkey, 7)
        std = 0.02
        eps = 0.001 / dim_seq
        w_seed = jax.random.uniform(k[4], (heads, dim_seq), jnp.float32, -eps, eps)
        pos_x = jnp.ones((heads, dim_seq), jnp.float32)
        pos_y = jnp.ones((heads, dim_seq), jnp.float32)
        epm_b = jnp.ones((heads, dim_seq), jnp.float32)[:, :S]          # (h, S)
        epm_b2d = jnp.repeat(epm_b.T, dh, axis=1)                       # (S, D)
        layers.append(dict(
            wq=std * jax.random.normal(k[0], (d_model, d_k), jnp.float32),
            wk=std * jax.random.normal(k[1], (d_model, d_k), jnp.float32),
            wv=std * jax.random.normal(k[2], (d_model, d_k), jnp.float32),
            wo=std * jax.random.normal(k[3], (d_k, d_model), jnp.float32),
            bo=jnp.zeros((1, d_model), jnp.float32),
            ln1_g=jnp.ones((1, d_model), jnp.float32),
            ln1_b=jnp.zeros((1, d_model), jnp.float32),
            wcirc=build_circulant(w_seed, pos_x, pos_y, S),
            epm_b=epm_b,
            epm_b2d=epm_b2d,
            w1=std * jax.random.normal(k[5], (d_model, d_ff), jnp.float32),
            b1=jnp.zeros((1, d_ff), jnp.float32),
            w2=std * jax.random.normal(k[6], (d_ff, d_model), jnp.float32),
            b2=jnp.zeros((1, d_model), jnp.float32),
            ln2_g=jnp.ones((1, d_model), jnp.float32),
            ln2_b=jnp.zeros((1, d_model), jnp.float32),
        ))
    return layers


# -----------------------------------------------------------------------------
# Pure-JAX reference (mirrors the PyTorch forward, full f32) for correctness.
# -----------------------------------------------------------------------------
def _ref_layer(x, prev, p, heads, dk):
    B, S, D = x.shape
    dh = D // heads
    q, k, v = x @ p['wq'], x @ p['wk'], x @ p['wv']
    sim = jnp.einsum('bid,bjd->bij', q, k) * (dk ** (-0.5)) + prev
    mask = jnp.triu(jnp.ones((S, S), bool), 1)
    sim = jnp.where(mask[None], NEG_MAX, sim)          # PyTorch carries -max in prev
    attn = jax.nn.softmax(sim, axis=-1)
    gate_res = jnp.einsum('bij,bjd->bid', attn, v) @ p['wo'] + p['bo'][0]

    gate = _layer_norm(x, p['ln1_g'][0], p['ln1_b'][0])
    g = gate.reshape(B, S, heads, dh).transpose(0, 2, 1, 3)
    g = jnp.einsum('bhnd,hmn->bhmd', g, p['wcirc'])
    g = g + p['epm_b'][None, :, :, None]
    g = g.transpose(0, 2, 1, 3).reshape(B, S, D)
    g = g + gate_res
    att = g * x

    h1 = jnp.maximum(att @ p['w1'] + p['b1'][0], 0.0)
    ff = h1 @ p['w2'] + p['b2'][0]
    out = _layer_norm(att + ff, p['ln2_g'][0], p['ln2_b'][0])
    return out, sim


def reference_encoder(x, layer_params, padding_idx, heads, dk):
    B, S, _ = x.shape
    mask = (jnp.sum(x, axis=-1) == padding_idx)[:, None, None, :]
    prev = jnp.zeros((B, S, S), jnp.float32)
    out = x
    for p in layer_params:
        out, prev = _ref_layer(out, prev, p, heads, dk)
    return out, mask


if __name__ == "__main__":
    # Small shapes consistent with the module: (batch, seq, d_model)
    B, S = 2, 8
    d_model, d_k, heads, d_ff = 32, 16, 8, 64
    N_layers = 2
    dim_seq = 50          # EPM fixed dim_seq (seq length S must be <= 50)
    padding_idx = 0

    key = jax.random.PRNGKey(0)
    kx, kp = jax.random.split(key)
    x = jax.random.normal(kx, (B, S, d_model), jnp.float32)
    params = init_params(kp, N_layers, d_model, d_k, heads, d_ff, dim_seq, S)

    out, attn_mask = multi_level_encoder(x, params, padding_idx, heads=heads, dk=d_k)
    out = jax.block_until_ready(out)
    attn_mask = jax.block_until_ready(attn_mask)

    assert out.shape == (B, S, d_model)
    assert attn_mask.shape == (B, 1, 1, S) and attn_mask.dtype == jnp.bool_

    ref_out, ref_mask = reference_encoder(x, params, padding_idx, heads, d_k)
    # bf16 matmul operands (f32 accumulation) vs full-f32 reference.
    np.testing.assert_allclose(np.asarray(out), np.asarray(ref_out),
                               rtol=2e-2, atol=2e-2)
    assert bool(jnp.all(attn_mask == ref_mask))

    print("KERNEL_OK")
</pallas_src>

<mosaic_0001>
module attributes {stable_mosaic.version = 11 : i64} {
  func.func @fused_encoder_kernel(%arg0: i32, %arg1: i32, %arg2: memref<1x8x32xf32, #tpu.memory_space<vmem>>, %arg3: memref<1x32x16xbf16, #tpu.memory_space<vmem>>, %arg4: memref<1x32x16xbf16, #tpu.memory_space<vmem>>, %arg5: memref<1x32x16xbf16, #tpu.memory_space<vmem>>, %arg6: memref<1x16x32xbf16, #tpu.memory_space<vmem>>, %arg7: memref<1x8x8x8xbf16, #tpu.memory_space<vmem>>, %arg8: memref<1x32x64xbf16, #tpu.memory_space<vmem>>, %arg9: memref<1x64x32xbf16, #tpu.memory_space<vmem>>, %arg10: memref<1x6x32xf32, #tpu.memory_space<vmem>>, %arg11: memref<1x1x64xf32, #tpu.memory_space<vmem>>, %arg12: memref<1x8x32xf32, #tpu.memory_space<vmem>>, %arg13: memref<1x8x32xf32, #tpu.memory_space<vmem>>, %arg14: memref<1x8x8xf32, #tpu.memory_space<vmem>>) attributes {dimension_semantics = [#tpu.dimension_semantics<parallel>, #tpu.dimension_semantics<arbitrary>], iteration_bounds = array<i64: 2, 2>, scalar_prefetch = 0 : i64, scratch_operands = 1 : i64, tpu.core_type = #tpu.core_type<tc>, window_params = [{transform_indices = @transform_0, window_bounds = array<i64: 1, 8, 32>}, {transform_indices = @transform_1, window_bounds = array<i64: 1, 32, 16>}, {transform_indices = @transform_2, window_bounds = array<i64: 1, 32, 16>}, {transform_indices = @transform_3, window_bounds = array<i64: 1, 32, 16>}, {transform_indices = @transform_4, window_bounds = array<i64: 1, 16, 32>}, {transform_indices = @transform_5, window_bounds = array<i64: 1, 8, 8, 8>}, {transform_indices = @transform_6, window_bounds = array<i64: 1, 32, 64>}, {transform_indices = @transform_7, window_bounds = array<i64: 1, 64, 32>}, {transform_indices = @transform_8, window_bounds = array<i64: 1, 6, 32>}, {transform_indices = @transform_9, window_bounds = array<i64: 1, 1, 64>}, {transform_indices = @transform_10, window_bounds = array<i64: 1, 8, 32>}, {transform_indices = @transform_11, window_bounds = array<i64: 1, 8, 32>}]} {
    %c0_i32 = arith.constant 0 : i32
    %0 = arith.cmpi eq, %arg1, %c0_i32 : i32
    %1 = arith.extui %0 : i1 to i32
    %c0_i32_0 = arith.constant 0 : i32
    %2 = arith.cmpi ne, %1, %c0_i32_0 : i32
    scf.if %2 {
      %c0_74 = arith.constant 0 : index
      %c0_75 = arith.constant 0 : index
      %c0_76 = arith.constant 0 : index
      %177 = vector.load %arg2[%c0_74, %c0_75, %c0_76] : memref<1x8x32xf32, #tpu.memory_space<vmem>>, vector<1x8x32xf32>
      %c0_77 = arith.constant 0 : index
      %c0_78 = arith.constant 0 : index
      %c0_79 = arith.constant 0 : index
      %178 = vector.load %arg13[%c0_77, %c0_78, %c0_79] : memref<1x8x32xf32, #tpu.memory_space<vmem>>, vector<1x8x32xf32>
      tpu.vector_store %arg13[%c0_77, %c0_78, %c0_79], %177 {strides = array<i32>} : memref<1x8x32xf32, #tpu.memory_space<vmem>>, vector<1x8x32xf32>,
      %cst_80 = arith.constant 0.000000e+00 : f32
      %179 = vector.broadcast %cst_80 : f32 to vector<1x8x8xf32>
      %c0_81 = arith.constant 0 : index
      %c0_82 = arith.constant 0 : index
      %c0_83 = arith.constant 0 : index
      %180 = vector.load %arg14[%c0_81, %c0_82, %c0_83] : memref<1x8x8xf32, #tpu.memory_space<vmem>>, vector<1x8x8xf32>
      tpu.vector_store %arg14[%c0_81, %c0_82, %c0_83], %179 {strides = array<i32>} : memref<1x8x8xf32, #tpu.memory_space<vmem>>, vector<1x8x8xf32>,
    } else {
    }
    %c0 = arith.constant 0 : index
    %c0_1 = arith.constant 0 : index
    %c0_2 = arith.constant 0 : index
    %3 = vector.load %arg13[%c0, %c0_1, %c0_2] : memref<1x8x32xf32, #tpu.memory_space<vmem>>, vector<1x8x32xf32>
    %c0_3 = arith.constant 0 : index
    %c0_4 = arith.constant 0 : index
    %c0_5 = arith.constant 0 : index
    %4 = vector.load %arg14[%c0_3, %c0_4, %c0_5] : memref<1x8x8xf32, #tpu.memory_space<vmem>>, vector<1x8x8xf32>
    %5 = vector.shape_cast %3 : vector<1x8x32xf32> to vector<8x32xf32>
    %6 = arith.truncf %5 : vector<8x32xf32> to vector<8x32xbf16>
    %c0_6 = arith.constant 0 : index
    %c0_7 = arith.constant 0 : index
    %c0_8 = arith.constant 0 : index
    %7 = vector.load %arg10[%c0_6, %c0_7, %c0_8] : memref<1x6x32xf32, #tpu.memory_space<vmem>>, vector<1x6x32xf32>
    %8 = vector.shape_cast %7 : vector<1x6x32xf32> to vector<6x32xf32>
    %9 = vector.extract_strided_slice %8 {offsets = [0, 0], sizes = [1, 32], strides = [1, 1]} : vector<6x32xf32> to vector<1x32xf32>
    %10 = vector.extract_strided_slice %8 {offsets = [1, 0], sizes = [1, 32], strides = [1, 1]} : vector<6x32xf32> to vector<1x32xf32>
    %11 = vector.extract_strided_slice %8 {offsets = [2, 0], sizes = [1, 32], strides = [1, 1]} : vector<6x32xf32> to vector<1x32xf32>
    %12 = vector.extract_strided_slice %8 {offsets = [3, 0], sizes = [1, 32], strides = [1, 1]} : vector<6x32xf32> to vector<1x32xf32>
    %13 = vector.extract_strided_slice %8 {offsets = [4, 0], sizes = [1, 32], strides = [1, 1]} : vector<6x32xf32> to vector<1x32xf32>
    %14 = vector.extract_strided_slice %8 {offsets = [5, 0], sizes = [1, 32], strides = [1, 1]} : vector<6x32xf32> to vector<1x32xf32>
    %c0_9 = arith.constant 0 : index
    %c0_10 = arith.constant 0 : index
    %c0_11 = arith.constant 0 : index
    %15 = vector.load %arg3[%c0_9, %c0_10, %c0_11] : memref<1x32x16xbf16, #tpu.memory_space<vmem>>, vector<1x32x16xbf16>
    %16 = vector.shape_cast %15 : vector<1x32x16xbf16> to vector<32x16xbf16>
    %cst = arith.constant dense<0.000000e+00> : vector<8x16xf32>
    %17 = tpu.matmul %6, %16, %cst {dimension_numbers = #tpu.dot_dimension_numbers<[1], [0], [0], [1], [0, 0, 1, 1], [], []>} : vector<8x32xbf16>, vector<32x16xbf16>, vector<8x16xf32> -> vector<8x16xf32>
    %c0_12 = arith.constant 0 : index
    %c0_13 = arith.constant 0 : index
    %c0_14 = arith.constant 0 : index
    %18 = vector.load %arg4[%c0_12, %c0_13, %c0_14] : memref<1x32x16xbf16, #tpu.memory_space<vmem>>, vector<1x32x16xbf16>
    %19 = vector.shape_cast %18 : vector<1x32x16xbf16> to vector<32x16xbf16>
    %cst_15 = arith.constant dense<0.000000e+00> : vector<8x16xf32>
    %20 = tpu.matmul %6, %19, %cst_15 {dimension_numbers = #tpu.dot_dimension_numbers<[1], [0], [0], [1], [0, 0, 1, 1], [], []>} : vector<8x32xbf16>, vector<32x16xbf16>, vector<8x16xf32> -> vector<8x16xf32>
    %c0_16 = arith.constant 0 : index
    %c0_17 = arith.constant 0 : index
    %c0_18 = arith.constant 0 : index
    %21 = vector.load %arg5[%c0_16, %c0_17, %c0_18] : memref<1x32x16xbf16, #tpu.memory_space<vmem>>, vector<1x32x16xbf16>
    %22 = vector.shape_cast %21 : vector<1x32x16xbf16> to vector<32x16xbf16>
    %cst_19 = arith.constant dense<0.000000e+00> : vector<8x16xf32>
    %23 = tpu.matmul %6, %22, %cst_19 {dimension_numbers = #tpu.dot_dimension_numbers<[1], [0], [0], [1], [0, 0, 1, 1], [], []>} : vector<8x32xbf16>, vector<32x16xbf16>, vector<8x16xf32> -> vector<8x16xf32>
    %24 = vector.shape_cast %17 : vector<8x16xf32> to vector<1x8x16xf32>
    %25 = arith.truncf %24 : vector<1x8x16xf32> to vector<1x8x16xbf16>
    %26 = vector.shape_cast %20 : vector<8x16xf32> to vector<1x8x16xf32>
    %27 = arith.truncf %26 : vector<1x8x16xf32> to vector<1x8x16xbf16>
    %28 = vector.shape_cast %23 : vector<8x16xf32> to vector<1x8x16xf32>
    %29 = arith.truncf %28 : vector<1x8x16xf32> to vector<1x8x16xbf16>
    "tpu.trace_start"() <{level = 10 : i32, message = "bid,bjd->bij"}> : () -> ()
    %cst_20 = arith.constant dense<0.000000e+00> : vector<1x8x8xf32>
    %30 = tpu.matmul %25, %27, %cst_20 {dimension_numbers = #tpu.dot_dimension_numbers<[2], [2], [1], [1], [0, 0, 0, 1, 1, 1], [0], [0]>} : vector<1x8x16xbf16>, vector<1x8x16xbf16>, vector<1x8x8xf32> -> vector<1x8x8xf32>
    "tpu.trace_stop"() : () -> ()
    %cst_21 = arith.constant 2.500000e-01 : f32
    %31 = vector.broadcast %cst_21 : f32 to vector<1x8x8xf32>
    %32 = arith.mulf %30, %31 : vector<1x8x8xf32>
    %33 = arith.addf %32, %4 : vector<1x8x8xf32>
    %34 = tpu.iota {dimensions = array<i32: 0>} : vector<8x8xi32>
    %35 = tpu.iota {dimensions = array<i32: 1>} : vector<8x8xi32>
    %36 = arith.cmpi sgt, %35, %34 : vector<8x8xi32>
    %37 = vector.shape_cast %36 : vector<8x8xi1> to vector<1x8x8xi1>
    %cst_22 = arith.constant 0.000000e+00 : f32
    %38 = vector.broadcast %cst_22 : f32 to vector<1x8x8xf32>
    %39 = arith.select %37, %38, %33 : vector<1x8x8xi1>, vector<1x8x8xf32>
    %c0_23 = arith.constant 0 : index
    %c0_24 = arith.constant 0 : index
    %c0_25 = arith.constant 0 : index
    %40 = vector.load %arg14[%c0_23, %c0_24, %c0_25] : memref<1x8x8xf32, #tpu.memory_space<vmem>>, vector<1x8x8xf32>
    tpu.vector_store %arg14[%c0_23, %c0_24, %c0_25], %39 {strides = array<i32>} : memref<1x8x8xf32, #tpu.memory_space<vmem>>, vector<1x8x8xf32>,
    %cst_26 = arith.constant -3.40282347E+38 : f32
    %41 = vector.broadcast %cst_26 : f32 to vector<1x8x8xf32>
    %42 = arith.select %37, %41, %33 : vector<1x8x8xi1>, vector<1x8x8xf32>
    %cst_27 = arith.constant dense<0xFF800000> : vector<1x8xf32>
    %43 = vector.multi_reduction <maximumf>, %42, %cst_27 [2] : vector<1x8x8xf32> to vector<1x8xf32>
    %44 = vector.shape_cast %43 : vector<1x8xf32> to vector<1x8x1xf32>
    %45 = vector.broadcast %44 : vector<1x8x1xf32> to vector<1x8x8xf32>
    %46 = arith.subf %42, %45 : vector<1x8x8xf32>
    %47 = math.exp %46 : vector<1x8x8xf32>
    %cst_28 = arith.constant dense<0.000000e+00> : vector<1x8xf32>
    %48 = vector.multi_reduction <add>, %47, %cst_28 [2] : vector<1x8x8xf32> to vector<1x8xf32>
    %49 = vector.shape_cast %48 : vector<1x8xf32> to vector<1x8x1xf32>
    %50 = tpu.reciprocal %49 {approx = true} : vector<1x8x1xf32> -> vector<1x8x1xf32>
    %51 = vector.broadcast %50 : vector<1x8x1xf32> to vector<1x8x8xf32>
    %52 = arith.mulf %47, %51 : vector<1x8x8xf32>
    %53 = arith.truncf %52 : vector<1x8x8xf32> to vector<1x8x8xbf16>
    "tpu.trace_start"() <{level = 10 : i32, message = "bij,bjd->bid"}> : () -> ()
    %cst_29 = arith.constant dense<0.000000e+00> : vector<1x8x16xf32>
    %54 = tpu.matmul %53, %29, %cst_29 {dimension_numbers = #tpu.dot_dimension_numbers<[2], [1], [1], [2], [0, 0, 0, 1, 1, 2], [0], [0]>} : vector<1x8x8xbf16>, vector<1x8x16xbf16>, vector<1x8x16xf32> -> vector<1x8x16xf32>
    "tpu.trace_stop"() : () -> ()
    %55 = vector.shape_cast %54 : vector<1x8x16xf32> to vector<8x16xf32>
    %56 = arith.truncf %55 : vector<8x16xf32> to vector<8x16xbf16>
    %c0_30 = arith.constant 0 : index
    %c0_31 = arith.constant 0 : index
    %c0_32 = arith.constant 0 : index
    %57 = vector.load %arg6[%c0_30, %c0_31, %c0_32] : memref<1x16x32xbf16, #tpu.memory_space<vmem>>, vector<1x16x32xbf16>
    %58 = vector.shape_cast %57 : vector<1x16x32xbf16> to vector<16x32xbf16>
    %cst_33 = arith.constant dense<0.000000e+00> : vector<8x32xf32>
    %59 = tpu.matmul %56, %58, %cst_33 {dimension_numbers = #tpu.dot_dimension_numbers<[1], [0], [0], [1], [0, 0, 1, 1], [], []>} : vector<8x16xbf16>, vector<16x32xbf16>, vector<8x32xf32> -> vector<8x32xf32>
    %60 = vector.broadcast %9 : vector<1x32xf32> to vector<8x32xf32>
    %61 = arith.addf %59, %60 : vector<8x32xf32>
    %cst_34 = arith.constant dense<0.000000e+00> : vector<8xf32>
    %62 = vector.multi_reduction <add>, %5, %cst_34 [1] : vector<8x32xf32> to vector<8xf32>
    %63 = vector.shape_cast %62 : vector<8xf32> to vector<8x1xf32>
    %cst_35 = arith.constant 3.200000e+01 : f32
    %64 = vector.broadcast %cst_35 : f32 to vector<8x1xf32>
    %65 = arith.divf %63, %64 : vector<8x1xf32>
    %66 = vector.broadcast %65 : vector<8x1xf32> to vector<8x32xf32>
    %67 = arith.subf %5, %66 : vector<8x32xf32>
    %68 = arith.mulf %67, %67 : vector<8x32xf32>
    %cst_36 = arith.constant dense<0.000000e+00> : vector<8xf32>
    %69 = vector.multi_reduction <add>, %68, %cst_36 [1] : vector<8x32xf32> to vector<8xf32>
    %70 = vector.shape_cast %69 : vector<8xf32> to vector<8x1xf32>
    %cst_37 = arith.constant 3.200000e+01 : f32
    %71 = vector.broadcast %cst_37 : f32 to vector<8x1xf32>
    %72 = arith.divf %70, %71 : vector<8x1xf32>
    %73 = vector.broadcast %65 : vector<8x1xf32> to vector<8x32xf32>
    %74 = arith.subf %5, %73 : vector<8x32xf32>
    %cst_38 = arith.constant 9.99999974E-6 : f32
    %75 = vector.broadcast %cst_38 : f32 to vector<8x1xf32>
    %76 = arith.addf %72, %75 : vector<8x1xf32>
    %77 = math.rsqrt %76 : vector<8x1xf32>
    %78 = vector.broadcast %77 : vector<8x1xf32> to vector<8x32xf32>
    %79 = arith.mulf %74, %78 : vector<8x32xf32>
    %80 = vector.broadcast %11 : vector<1x32xf32> to vector<8x32xf32>
    %81 = arith.mulf %79, %80 : vector<8x32xf32>
    %82 = vector.broadcast %12 : vector<1x32xf32> to vector<8x32xf32>
    %83 = arith.addf %81, %82 : vector<8x32xf32>
    %84 = vector.shape_cast %83 : vector<8x32xf32> to vector<1x8x32xf32>
    %85 = arith.truncf %84 : vector<1x8x32xf32> to vector<1x8x32xbf16>
    %c0_39 = arith.constant 0 : index
    %c0_40 = arith.constant 0 : index
    %c0_41 = arith.constant 0 : index
    %c0_42 = arith.constant 0 : index
    %86 = vector.load %arg7[%c0_39, %c0_40, %c0_41, %c0_42] : memref<1x8x8x8xbf16, #tpu.memory_space<vmem>>, vector<1x8x8x8xbf16>
    %87 = vector.shape_cast %86 : vector<1x8x8x8xbf16> to vector<8x8x8xbf16>
    %88 = vector.extract_strided_slice %87 {offsets = [0, 0, 0], sizes = [1, 8, 8], strides = [1, 1, 1]} : vector<8x8x8xbf16> to vector<1x8x8xbf16>
    %89 = vector.shape_cast %88 : vector<1x8x8xbf16> to vector<8x8xbf16>
    %90 = vector.shape_cast %89 : vector<8x8xbf16> to vector<1x8x8xbf16>
    %91 = vector.extract_strided_slice %85 {offsets = [0, 0, 0], sizes = [1, 8, 4], strides = [1, 1, 1]} : vector<1x8x32xbf16> to vector<1x8x4xbf16>
    "tpu.trace_start"() <{level = 10 : i32, message = "bmn,bnd->bmd"}> : () -> ()
    %cst_43 = arith.constant dense<0.000000e+00> : vector<1x8x4xf32>
    %92 = tpu.matmul %90, %91, %cst_43 {dimension_numbers = #tpu.dot_dimension_numbers<[2], [1], [1], [2], [0, 0, 0, 1, 1, 2], [0], [0]>} : vector<1x8x8xbf16>, vector<1x8x4xbf16>, vector<1x8x4xf32> -> vector<1x8x4xf32>
    "tpu.trace_stop"() : () -> ()
    %93 = vector.extract_strided_slice %87 {offsets = [1, 0, 0], sizes = [1, 8, 8], strides = [1, 1, 1]} : vector<8x8x8xbf16> to vector<1x8x8xbf16>
    %94 = vector.shape_cast %93 : vector<1x8x8xbf16> to vector<8x8xbf16>
    %95 = vector.shape_cast %94 : vector<8x8xbf16> to vector<1x8x8xbf16>
    %96 = vector.extract_strided_slice %85 {offsets = [0, 0, 4], sizes = [1, 8, 4], strides = [1, 1, 1]} : vector<1x8x32xbf16> to vector<1x8x4xbf16>
    "tpu.trace_start"() <{level = 10 : i32, message = "bmn,bnd->bmd"}> : () -> ()
    %cst_44 = arith.constant dense<0.000000e+00> : vector<1x8x4xf32>
    %97 = tpu.matmul %95, %96, %cst_44 {dimension_numbers = #tpu.dot_dimension_numbers<[2], [1], [1], [2], [0, 0, 0, 1, 1, 2], [0], [0]>} : vector<1x8x8xbf16>, vector<1x8x4xbf16>, vector<1x8x4xf32> -> vector<1x8x4xf32>
    "tpu.trace_stop"() : () -> ()
    %98 = vector.extract_strided_slice %87 {offsets = [2, 0, 0], sizes = [1, 8, 8], strides = [1, 1, 1]} : vector<8x8x8xbf16> to vector<1x8x8xbf16>
    %99 = vector.shape_cast %98 : vector<1x8x8xbf16> to vector<8x8xbf16>
    %100 = vector.shape_cast %99 : vector<8x8xbf16> to vector<1x8x8xbf16>
    %101 = vector.extract_strided_slice %85 {offsets = [0, 0, 8], sizes = [1, 8, 4], strides = [1, 1, 1]} : vector<1x8x32xbf16> to vector<1x8x4xbf16>
    "tpu.trace_start"() <{level = 10 : i32, message = "bmn,bnd->bmd"}> : () -> ()
    %cst_45 = arith.constant dense<0.000000e+00> : vector<1x8x4xf32>
    %102 = tpu.matmul %100, %101, %cst_45 {dimension_numbers = #tpu.dot_dimension_numbers<[2], [1], [1], [2], [0, 0, 0, 1, 1, 2], [0], [0]>} : vector<1x8x8xbf16>, vector<1x8x4xbf16>, vector<1x8x4xf32> -> vector<1x8x4xf32>
    "tpu.trace_stop"() : () -> ()
    %103 = vector.extract_strided_slice %87 {offsets = [3, 0, 0], sizes = [1, 8, 8], strides = [1, 1, 1]} : vector<8x8x8xbf16> to vector<1x8x8xbf16>
    %104 = vector.shape_cast %103 : vector<1x8x8xbf16> to vector<8x8xbf16>
    %105 = vector.shape_cast %104 : vector<8x8xbf16> to vector<1x8x8xbf16>
    %106 = vector.extract_strided_slice %85 {offsets = [0, 0, 12], sizes = [1, 8, 4], strides = [1, 1, 1]} : vector<1x8x32xbf16> to vector<1x8x4xbf16>
    "tpu.trace_start"() <{level = 10 : i32, message = "bmn,bnd->bmd"}> : () -> ()
    %cst_46 = arith.constant dense<0.000000e+00> : vector<1x8x4xf32>
    %107 = tpu.matmul %105, %106, %cst_46 {dimension_numbers = #tpu.dot_dimension_numbers<[2], [1], [1], [2], [0, 0, 0, 1, 1, 2], [0], [0]>} : vector<1x8x8xbf16>, vector<1x8x4xbf16>, vector<1x8x4xf32> -> vector<1x8x4xf32>
    "tpu.trace_stop"() : () -> ()
    %108 = vector.extract_strided_slice %87 {offsets = [4, 0, 0], sizes = [1, 8, 8], strides = [1, 1, 1]} : vector<8x8x8xbf16> to vector<1x8x8xbf16>
    %109 = vector.shape_cast %108 : vector<1x8x8xbf16> to vector<8x8xbf16>
    %110 = vector.shape_cast %109 : vector<8x8xbf16> to vector<1x8x8xbf16>
    %111 = vector.extract_strided_slice %85 {offsets = [0, 0, 16], sizes = [1, 8, 4], strides = [1, 1, 1]} : vector<1x8x32xbf16> to vector<1x8x4xbf16>
    "tpu.trace_start"() <{level = 10 : i32, message = "bmn,bnd->bmd"}> : () -> ()
    %cst_47 = arith.constant dense<0.000000e+00> : vector<1x8x4xf32>
    %112 = tpu.matmul %110, %111, %cst_47 {dimension_numbers = #tpu.dot_dimension_numbers<[2], [1], [1], [2], [0, 0, 0, 1, 1, 2], [0], [0]>} : vector<1x8x8xbf16>, vector<1x8x4xbf16>, vector<1x8x4xf32> -> vector<1x8x4xf32>
    "tpu.trace_stop"() : () -> ()
    %113 = vector.extract_strided_slice %87 {offsets = [5, 0, 0], sizes = [1, 8, 8], strides = [1, 1, 1]} : vector<8x8x8xbf16> to vector<1x8x8xbf16>
    %114 = vector.shape_cast %113 : vector<1x8x8xbf16> to vector<8x8xbf16>
    %115 = vector.shape_cast %114 : vector<8x8xbf16> to vector<1x8x8xbf16>
    %116 = vector.extract_strided_slice %85 {offsets = [0, 0, 20], sizes = [1, 8, 4], strides = [1, 1, 1]} : vector<1x8x32xbf16> to vector<1x8x4xbf16>
    "tpu.trace_start"() <{level = 10 : i32, message = "bmn,bnd->bmd"}> : () -> ()
    %cst_48 = arith.constant dense<0.000000e+00> : vector<1x8x4xf32>
    %117 = tpu.matmul %115, %116, %cst_48 {dimension_numbers = #tpu.dot_dimension_numbers<[2], [1], [1], [2], [0, 0, 0, 1, 1, 2], [0], [0]>} : vector<1x8x8xbf16>, vector<1x8x4xbf16>, vector<1x8x4xf32> -> vector<1x8x4xf32>
    "tpu.trace_stop"() : () -> ()
    %118 = vector.extract_strided_slice %87 {offsets = [6, 0, 0], sizes = [1, 8, 8], strides = [1, 1, 1]} : vector<8x8x8xbf16> to vector<1x8x8xbf16>
    %119 = vector.shape_cast %118 : vector<1x8x8xbf16> to vector<8x8xbf16>
    %120 = vector.shape_cast %119 : vector<8x8xbf16> to vector<1x8x8xbf16>
    %121 = vector.extract_strided_slice %85 {offsets = [0, 0, 24], sizes = [1, 8, 4], strides = [1, 1, 1]} : vector<1x8x32xbf16> to vector<1x8x4xbf16>
    "tpu.trace_start"() <{level = 10 : i32, message = "bmn,bnd->bmd"}> : () -> ()
    %cst_49 = arith.constant dense<0.000000e+00> : vector<1x8x4xf32>
    %122 = tpu.matmul %120, %121, %cst_49 {dimension_numbers = #tpu.dot_dimension_numbers<[2], [1], [1], [2], [0, 0, 0, 1, 1, 2], [0], [0]>} : vector<1x8x8xbf16>, vector<1x8x4xbf16>, vector<1x8x4xf32> -> vector<1x8x4xf32>
    "tpu.trace_stop"() : () -> ()
    %123 = vector.extract_strided_slice %87 {offsets = [7, 0, 0], sizes = [1, 8, 8], strides = [1, 1, 1]} : vector<8x8x8xbf16> to vector<1x8x8xbf16>
    %124 = vector.shape_cast %123 : vector<1x8x8xbf16> to vector<8x8xbf16>
    %125 = vector.shape_cast %124 : vector<8x8xbf16> to vector<1x8x8xbf16>
    %126 = vector.extract_strided_slice %85 {offsets = [0, 0, 28], sizes = [1, 8, 4], strides = [1, 1, 1]} : vector<1x8x32xbf16> to vector<1x8x4xbf16>
    "tpu.trace_start"() <{level = 10 : i32, message = "bmn,bnd->bmd"}> : () -> ()
    %cst_50 = arith.constant dense<0.000000e+00> : vector<1x8x4xf32>
    %127 = tpu.matmul %125, %126, %cst_50 {dimension_numbers = #tpu.dot_dimension_numbers<[2], [1], [1], [2], [0, 0, 0, 1, 1, 2], [0], [0]>} : vector<1x8x8xbf16>, vector<1x8x4xbf16>, vector<1x8x4xf32> -> vector<1x8x4xf32>
    "tpu.trace_stop"() : () -> ()
    %128 = tpu.concatenate %92, %97, %102, %107, %112, %117, %122, %127 in 2 : vector<1x8x4xf32>, vector<1x8x4xf32>, vector<1x8x4xf32>, vector<1x8x4xf32>, vector<1x8x4xf32>, vector<1x8x4xf32>, vector<1x8x4xf32>, vector<1x8x4xf32> -> vector<1x8x32xf32>
    %c0_51 = arith.constant 0 : index
    %c0_52 = arith.constant 0 : index
    %c0_53 = arith.constant 0 : index
    %129 = vector.load %arg12[%c0_51, %c0_52, %c0_53] : memref<1x8x32xf32, #tpu.memory_space<vmem>>, vector<1x8x32xf32>
    %130 = vector.shape_cast %129 : vector<1x8x32xf32> to vector<8x32xf32>
    %131 = vector.shape_cast %130 : vector<8x32xf32> to vector<1x8x32xf32>
    %132 = arith.addf %128, %131 : vector<1x8x32xf32>
    %133 = vector.shape_cast %132 : vector<1x8x32xf32> to vector<8x32xf32>
    %134 = arith.addf %133, %61 : vector<8x32xf32>
    %135 = arith.mulf %134, %5 : vector<8x32xf32>
    %136 = arith.truncf %135 : vector<8x32xf32> to vector<8x32xbf16>
    %c0_54 = arith.constant 0 : index
    %c0_55 = arith.constant 0 : index
    %c0_56 = arith.constant 0 : index
    %137 = vector.load %arg8[%c0_54, %c0_55, %c0_56] : memref<1x32x64xbf16, #tpu.memory_space<vmem>>, vector<1x32x64xbf16>
    %138 = vector.shape_cast %137 : vector<1x32x64xbf16> to vector<32x64xbf16>
    %cst_57 = arith.constant dense<0.000000e+00> : vector<8x64xf32>
    %139 = tpu.matmul %136, %138, %cst_57 {dimension_numbers = #tpu.dot_dimension_numbers<[1], [0], [0], [1], [0, 0, 1, 1], [], []>} : vector<8x32xbf16>, vector<32x64xbf16>, vector<8x64xf32> -> vector<8x64xf32>
    %c0_58 = arith.constant 0 : index
    %c0_59 = arith.constant 0 : index
    %c0_60 = arith.constant 0 : index
    %140 = vector.load %arg11[%c0_58, %c0_59, %c0_60] : memref<1x1x64xf32, #tpu.memory_space<vmem>>, vector<1x1x64xf32>
    %141 = vector.shape_cast %140 : vector<1x1x64xf32> to vector<1x64xf32>
    %142 = vector.broadcast %141 : vector<1x64xf32> to vector<8x64xf32>
    %143 = arith.addf %139, %142 : vector<8x64xf32>
    %cst_61 = arith.constant 0.000000e+00 : f32
    %144 = vector.broadcast %cst_61 : f32 to vector<8x64xf32>
    %145 = arith.maximumf %143, %144 : vector<8x64xf32>
    %146 = arith.truncf %145 : vector<8x64xf32> to vector<8x64xbf16>
    %c0_62 = arith.constant 0 : index
    %c0_63 = arith.constant 0 : index
    %c0_64 = arith.constant 0 : index
    %147 = vector.load %arg9[%c0_62, %c0_63, %c0_64] : memref<1x64x32xbf16, #tpu.memory_space<vmem>>, vector<1x64x32xbf16>
    %148 = vector.shape_cast %147 : vector<1x64x32xbf16> to vector<64x32xbf16>
    %cst_65 = arith.constant dense<0.000000e+00> : vector<8x32xf32>
    %149 = tpu.matmul %146, %148, %cst_65 {dimension_numbers = #tpu.dot_dimension_numbers<[1], [0], [0], [1], [0, 0, 1, 1], [], []>} : vector<8x64xbf16>, vector<64x32xbf16>, vector<8x32xf32> -> vector<8x32xf32>
    %150 = vector.broadcast %10 : vector<1x32xf32> to vector<8x32xf32>
    %151 = arith.addf %149, %150 : vector<8x32xf32>
    %152 = arith.addf %135, %151 : vector<8x32xf32>
    %cst_66 = arith.constant dense<0.000000e+00> : vector<8xf32>
    %153 = vector.multi_reduction <add>, %152, %cst_66 [1] : vector<8x32xf32> to vector<8xf32>
    %154 = vector.shape_cast %153 : vector<8xf32> to vector<8x1xf32>
    %cst_67 = arith.constant 3.200000e+01 : f32
    %155 = vector.broadcast %cst_67 : f32 to vector<8x1xf32>
    %156 = arith.divf %154, %155 : vector<8x1xf32>
    %157 = vector.broadcast %156 : vector<8x1xf32> to vector<8x32xf32>
    %158 = arith.subf %152, %157 : vector<8x32xf32>
    %159 = arith.mulf %158, %158 : vector<8x32xf32>
    %cst_68 = arith.constant dense<0.000000e+00> : vector<8xf32>
    %160 = vector.multi_reduction <add>, %159, %cst_68 [1] : vector<8x32xf32> to vector<8xf32>
    %161 = vector.shape_cast %160 : vector<8xf32> to vector<8x1xf32>
    %cst_69 = arith.constant 3.200000e+01 : f32
    %162 = vector.broadcast %cst_69 : f32 to vector<8x1xf32>
    %163 = arith.divf %161, %162 : vector<8x1xf32>
    %164 = vector.broadcast %156 : vector<8x1xf32> to vector<8x32xf32>
    %165 = arith.subf %152, %164 : vector<8x32xf32>
    %cst_70 = arith.constant 9.99999974E-6 : f32
    %166 = vector.broadcast %cst_70 : f32 to vector<8x1xf32>
    %167 = arith.addf %163, %166 : vector<8x1xf32>
    %168 = math.rsqrt %167 : vector<8x1xf32>
    %169 = vector.broadcast %168 : vector<8x1xf32> to vector<8x32xf32>
    %170 = arith.mulf %165, %169 : vector<8x32xf32>
    %171 = vector.broadcast %13 : vector<1x32xf32> to vector<8x32xf32>
    %172 = arith.mulf %170, %171 : vector<8x32xf32>
    %173 = vector.broadcast %14 : vector<1x32xf32> to vector<8x32xf32>
    %174 = arith.addf %172, %173 : vector<8x32xf32>
    %175 = vector.shape_cast %174 : vector<8x32xf32> to vector<1x8x32xf32>
    %c0_71 = arith.constant 0 : index
    %c0_72 = arith.constant 0 : index
    %c0_73 = arith.constant 0 : index
    %176 = vector.load %arg13[%c0_71, %c0_72, %c0_73] : memref<1x8x32xf32, #tpu.memory_space<vmem>>, vector<1x8x32xf32>
    tpu.vector_store %arg13[%c0_71, %c0_72, %c0_73], %175 {strides = array<i32>} : memref<1x8x32xf32, #tpu.memory_space<vmem>>, vector<1x8x32xf32>,
    return
  }
  func.func @transform_0(%arg0: i32, %arg1: i32) -> (i32, i32, i32) {
    %c0_i32 = arith.constant 0 : i32
    %c0_i32_0 = arith.constant 0 : i32
    %c0_i32_1 = arith.constant 0 : i32
    return %arg0, %c0_i32, %c0_i32_0 : i32, i32, i32
  }
  func.func @transform_1(%arg0: i32, %arg1: i32) -> (i32, i32, i32) {
    %c0_i32 = arith.constant 0 : i32
    %c0_i32_0 = arith.constant 0 : i32
    %c0_i32_1 = arith.constant 0 : i32
    return %arg1, %c0_i32, %c0_i32_0 : i32, i32, i32
  }
  func.func @transform_2(%arg0: i32, %arg1: i32) -> (i32, i32, i32) {
    %c0_i32 = arith.constant 0 : i32
    %c0_i32_0 = arith.constant 0 : i32
    %c0_i32_1 = arith.constant 0 : i32
    return %arg1, %c0_i32, %c0_i32_0 : i32, i32, i32
  }
  func.func @transform_3(%arg0: i32, %arg1: i32) -> (i32, i32, i32) {
    %c0_i32 = arith.constant 0 : i32
    %c0_i32_0 = arith.constant 0 : i32
    %c0_i32_1 = arith.constant 0 : i32
    return %arg1, %c0_i32, %c0_i32_0 : i32, i32, i32
  }
  func.func @transform_4(%arg0: i32, %arg1: i32) -> (i32, i32, i32) {
    %c0_i32 = arith.constant 0 : i32
    %c0_i32_0 = arith.constant 0 : i32
    %c0_i32_1 = arith.constant 0 : i32
    return %arg1, %c0_i32, %c0_i32_0 : i32, i32, i32
  }
  func.func @transform_5(%arg0: i32, %arg1: i32) -> (i32, i32, i32, i32) {
    %c0_i32 = arith.constant 0 : i32
    %c0_i32_0 = arith.constant 0 : i32
    %c0_i32_1 = arith.constant 0 : i32
    %c0_i32_2 = arith.constant 0 : i32
    return %arg1, %c0_i32, %c0_i32_0, %c0_i32_1 : i32, i32, i32, i32
  }
  func.func @transform_6(%arg0: i32, %arg1: i32) -> (i32, i32, i32) {
    %c0_i32 = arith.constant 0 : i32
    %c0_i32_0 = arith.constant 0 : i32
    %c0_i32_1 = arith.constant 0 : i32
    return %arg1, %c0_i32, %c0_i32_0 : i32, i32, i32
  }
  func.func @transform_7(%arg0: i32, %arg1: i32) -> (i32, i32, i32) {
    %c0_i32 = arith.constant 0 : i32
    %c0_i32_0 = arith.constant 0 : i32
    %c0_i32_1 = arith.constant 0 : i32
    return %arg1, %c0_i32, %c0_i32_0 : i32, i32, i32
  }
  func.func @transform_8(%arg0: i32, %arg1: i32) -> (i32, i32, i32) {
    %c0_i32 = arith.constant 0 : i32
    %c0_i32_0 = arith.constant 0 : i32
    %c0_i32_1 = arith.constant 0 : i32
    return %arg1, %c0_i32, %c0_i32_0 : i32, i32, i32
  }
  func.func @transform_9(%arg0: i32, %arg1: i32) -> (i32, i32, i32) {
    %c0_i32 = arith.constant 0 : i32
    %c0_i32_0 = arith.constant 0 : i32
    %c0_i32_1 = arith.constant 0 : i32
    return %arg1, %c0_i32, %c0_i32_0 : i32, i32, i32
  }
  func.func @transform_10(%arg0: i32, %arg1: i32) -> (i32, i32, i32) {
    %c0_i32 = arith.constant 0 : i32
    %c0_i32_0 = arith.constant 0 : i32
    %c0_i32_1 = arith.constant 0 : i32
    return %arg1, %c0_i32, %c0_i32_0 : i32, i32, i32
  }
  func.func @transform_11(%arg0: i32, %arg1: i32) -> (i32, i32, i32) {
    %c0_i32 = arith.constant 0 : i32
    %c0_i32_0 = arith.constant 0 : i32
    %c0_i32_1 = arith.constant 0 : i32
    return %arg0, %c0_i32, %c0_i32_0 : i32, i32, i32
  }
}

</mosaic_0001>

<bundles_post_ra>
// kernel: tpu_custom_call.1
= control target key start
LH: loop header
LB: loop body
LE: loop exit
PB: predicated region body
PF: predicated region fallthrough
CT: control target
= control target key end

     0   :  { %s2612_s0 = inlined_call_operand.vmem [shape: f32[2,8,32], index: 0, kind: input, shape index: {}]   ;;  %s2613_s1 = inlined_call_operand.vmem [shape: bf16[2,32,16], index: 1, kind: input, shape index: {}]   ;;  %s2614_s2 = inlined_call_operand.vmem [shape: bf16[2,32,16], index: 2, kind: input, shape index: {}]   ;;  %s2615_s3 = inlined_call_operand.vmem [shape: bf16[2,32,16], index: 3, kind: input, shape index: {}]   ;;  %s2616_s4 = inlined_call_operand.vmem [shape: bf16[2,16,32], index: 4, kind: input, shape index: {}]   ;;  %s2617_s5 = inlined_call_operand.vmem [shape: bf16[2,8,8,8], index: 5, kind: input, shape index: {}]   ;;  %s2618_s6 = inlined_call_operand.vmem [shape: bf16[2,32,64], index: 6, kind: input, shape index: {}]   ;;  %s2619_s7 = inlined_call_operand.vmem [shape: bf16[2,64,32], index: 7, kind: input, shape index: {}]   ;;  %s2620_s8 = inlined_call_operand.vmem [shape: f32[2,6,32], index: 8, kind: input, shape index: {}]   ;;  %s2621_s9 = inlined_call_operand.vmem [shape: f32[2,1,64], index: 9, kind: input, shape index: {}]   ;;  %s2622_s10 = inlined_call_operand.vmem [shape: f32[2,8,32], index: 10, kind: input, shape index: {}]   ;;  %s2623_s11 = inlined_call_operand.hbm [shape: f32[2,8,32], index: 11, kind: output, shape index: {}]  }
   0x1   :  { %2638 = sst [smem:[#allocation18_spill]] %s2612_s0 }
   0x2   :  { %2639 = sst [smem:[#allocation19_spill]] %s2613_s1 }
   0x3   :  { %2640 = sst [smem:[#allocation20_spill]] %s2614_s2 }
   0x4   :  { %2641 = sst [smem:[#allocation21_spill]] %s2615_s3 }
   0x5   :  { %2642 = sst [smem:[#allocation22_spill]] %s2616_s4 }
   0x6   :  { %2643 = sst [smem:[#allocation23_spill]] %s2617_s5 }
   0x7   :  { %2644 = sst [smem:[#allocation24_spill]] %s2623_s11 }
   0x8   :  { %16 = vsyncpa [#allocation4], 0 }
   0x9   :  { %18 = vsyncpa [#allocation4 + $0x1], 0  ;;  %s2274_s17 = smov 0   ;;  %s2276_s18 = smov 0  }
   0xa   :  { %s2278_s19 = smov 0   ;;  %s2280_s20 = smov 0  }
   0xb   :  { %s2282_s21 = smov 0   ;;  %s2284_s22 = smov 0  }
   0xc   :  { %s2286_s23 = smov 0   ;;  %s2288_s24 = smov 0  }
   0xd LB: > { %2645 = sst [smem:[#allocation6_spill]] %s2166_s17  ;;  %s1779_s25 = sadd.s32 4294967295, %s2194_s24   ;;  %s2194_s24 = sphi %s2288_s24, %s24_s24   ;;  %s2190_s23 = sphi %s2286_s23, %s2682_s23   ;;  %s2186_s22 = sphi %s2284_s22, %s2681_s22   ;;  %s2182_s21 = sphi %s2282_s21, %s2680_s21   ;;  %s2178_s20 = sphi %s2280_s20, %s2679_s20   ;;  %s2174_s19 = sphi %s2278_s19, %s2678_s19   ;;  %s2170_s18 = sphi %s2276_s18, %s2677_s18   ;;  %s2166_s17 = sphi %s2274_s17, %s2676_s17  }
   0xe   : > { %2646 = sst [smem:[#allocation7_spill]] %s2170_s18  ;;  %s1780_s26 = sadd.s32 4294967294, %s2194_s24  }
   0xf   : > { %2647 = sst [smem:[#allocation8_spill]] %s2174_s19  ;;  %s33_s27 = sadd.s32 1, %s2186_s22 }
  0x10   : > { %2648 = sst [smem:[#allocation9_spill]] %s2182_s21  ;;  %p34_p0 = scmp.ge.s32.totalorder %s33_s27, 2 }
  0x11   : > { %2649 = sst [smem:[#allocation10_spill]] %s2186_s22  ;;  %s36_s28 = sadd.s32 1, %s2190_s23 }
  0x12   : > { %2650 = sst [smem:[#allocation11_spill]] %s2190_s23  ;;  %p339_p1 = scmp.ne.s32.totalorder %s2174_s19, %s2170_s18 }
  0x13   : > { %2651 = sst [smem:[#allocation12_spill]] %s2194_s24  ;;  %p340_p2 = scmp.eq.s32.totalorder %s1779_s25, 3 }
  0x14   : > { %s2684_s27 = smov (%p34_p0, %s33_s27), 0  ;;  %s2686_s28 = smov (!%p34_p0, %s36_s28), %s2190_s23 }
  0x15   : > { %2652 = sst [smem:[#allocation13_spill]] %s2684_s27  ;;  %p2323_p3 = por %p340_p2, %p339_p1 }
  0x16   : > { %p345_p4 = scmp.ne.s32.totalorder %s2170_s18, %s2166_s17  ;;  %p38_p5 = scmp.ge.s32.totalorder %s2686_s28, 2 }
  0x17   : > { %s2653_s29 = scalar_select %p2323_p3, 1, 0 }
  0x18   : > { %p346_p6 = scmp.eq.s32.totalorder %s1780_s26, 3  ;;  %p1783_p7 = scmp.ge.s32.totalorder %s2194_s24, 1 }
  0x19   : > { %2654 = sst [smem:[#allocation14_spill]] %s2653_s29  ;;  %p447_p8 = scmp.lt.s32.totalorder %s2194_s24, 5 }
  0x1a   : > { %s2688_s28 = smov (%p38_p5, %s2686_s28), 0  ;;  %p2333_p9 = por %p346_p6, %p345_p4 }
  0x1b   : > { %2655 = sst [smem:[#allocation15_spill]] %s2688_s28  ;;  %p448_p10 = pnand %p1783_p7, %p447_p8 }
  0x1c   : > { %s2656_s30 = scalar_select %p2333_p9, 1, 0 }
  0x1d   : > { %s326_s12 = ssub.s32 %s2190_s23, %s2688_s28  ;;  %s329_s13 = sadd.s32 1, %s2174_s19 }
  0x1e   : > { %2657 = sst [smem:[#allocation16_spill]] %s2656_s30  ;;  %p327_p11 = scmp.eq.s32.totalorder %s326_s12, 0 }
  0x1f   : > { %451 = sbr.rel (%p448_p10) target bundleno = 2040 (0x7f8), region = 64  ;;  %s2628_s15 = sand.u32 (!%p448_p10), 1, %s2170_s18  }
  0x20   : > { %s2341_s14 = scalar_select %p327_p11, %s2174_s19, %s329_s13  }
  0x21   : > { %p532_p12 = scmp.lt.s32.totalorder (!%p448_p10), %s2182_s21, 1  ;;  %s1784_s16 = sshll.u32 (!%p448_p10), %s2628_s15, 3 }
  0x22   : > { %2658 = sst [smem:[#allocation17_spill]] %s2341_s14  ;;  %p536_p13 = scmp.lt.s32.totalorder (!%p448_p10), %s2178_s20, 1 }
  0x23   : > { %s2659_s0 = sld [smem:[#allocation18_spill]] (!%p448_p10)  ;;  %p1802_p0 = scmp.ne.s32.totalorder (!%p448_p10), %s2178_s20, 0 }
  0x24   : > { %s533_s25 = scalar_select %p532_p12, %s2182_s21, 1 }
  0x25   : > { %s2350_s26 = scalar_select %p536_p13, %s2178_s20, 1 }
  0x26   : > { %s1785_s12 = sshll.u32 %s533_s25, 3  ;;  %s2660_s1 = sld [smem:[#allocation19_spill]] }
  0x27   : > { %s1837_s23 = sshll.u32 %s2350_s26, 4  ;;  %s2661_s2 = sld [smem:[#allocation20_spill]] }
  0x28   : > { %s2662_s3 = sld [smem:[#allocation21_spill]]  ;;  %s2370_s25 = sshll.u32 %s2350_s26, 3 }
  0x29   : > { %s535_s27 = scalar_lea.vmem %s2659_s0, %s1785_s12  ;;  %s1841_s14 = sshll.u32 %s2350_s26, 5 }
  0x2a   : > { %s2664_s5 = sld [smem:[#allocation23_spill]]  ;;  %s2385_s11 = scalar_lea.vmem %s2618_s6, %s1837_s23 }
  0x2b   : > { %s574_s22 = scalar_lea.vmem %s2620_s8, %s2370_s25  ;;  %s577_s0 = scalar_lea.vmem %s2621_s9, %s2350_s26 }
  0x2c   : > { %s2359_s19 = scalar_lea.vmem %s2660_s1, %s1837_s23  ;;  %s581_s4 = scalar_lea.vmem %s2622_s10, %s2370_s25 }
  0x2d   : > { %s545_s17 = scalar_lea.vmem %s2661_s2, %s1837_s23  ;;  %s2404_s1 = scalar_lea.vmem [#allocation3], %s1784_s16 }
  0x2e   : > { %s2367_s29 = scalar_lea.vmem %s2662_s3, %s1837_s23  ;;  %s2390_s3 = scalar_lea.vmem %s2619_s7, %s1841_s14 }
  0x2f   : > { %586 = sbr.rel (%p1802_p0) target bundleno = 55 (0x37), region = 68 }
  0x30   : > { %s2380_s30 = scalar_lea.vmem %s2664_s5, %s1841_s14 }
  0x34   : > { %v587_v0 = vld [vmem:[%s535_s27] sm:$0xff]  ;;  %vm588_vm0 = vcmask 261120   ;;  %vm590_vm1 = vcmask 64512   ;;  %v2196_v1 = vmov 0.0  }
  0x35   : > { %589 = vst.msk [vmem:[%s2404_s1] sm:$0xff] %vm588_vm0, %v587_v0 }
  0x36   : > { %591 = vst.msk [vmem:[#allocation2] sm:$0xff] %vm590_vm1, %v2196_v1 }
  0x37 PF: > { %v2081_v2 = vld [vmem:[%s545_s17 + $0x8] sm:$0xff]   ;;  %v2197_v3 = vmov 0.0   ;;  %v2083_v5 = vld [vmem:[%s545_s17] sm:$0xff]   ;;  %vm2198_vm2 = vmmov 0   ;;  %vm612_vm3 = vcmask 261120   ;;  %vm771_vm4 = vcmask 130048  }
  0x38   : > { %1891 = vmatprep.subr.bf16.mxu1 %v2197_v3  ;;  %1883 = vmatprep.subr.bf16.mxu0 %v2197_v3  ;;  %v2082_v4 = vld [vmem:[%s2359_s19 + $0x8] sm:$0xff]   ;;  %v2084_v6 = vld [vmem:[%s2359_s19] sm:$0xff]   ;;  %v820_v28 = vlaneseq  ;;  %vm826_vm6 = vcmask 64512   ;;  %s2199_s17 = smov 120   ;;  %s2200_s18 = smov 116   ;;  %vm844_vm7 = vcmask 1043456  }
  0x39   : > { %1892 = vmatpush3.bf16.msra.mxu1 %v2081_v2  ;;  %1895 = vmatprep.mubr.msk.bf16.mxu1 %vm2198_vm2, %v2197_v3  ;;  %v2085_v22 = vld [vmem:[%s2367_s29 + $0x8] sm:$0xff]   ;;  %v2086_v24 = vld [vmem:[%s2367_s29] sm:$0xff]   ;;  %s2201_s19 = smov 112   ;;  %s2202_s20 = smov 104   ;;  %vm1388_vm8 = vcmask 31744   ;;  %vm1391_vm9 = vcmask 97280  }
  0x3a   : > { %1884 = vmatpush3.bf16.msra.mxu0 %v2082_v4  ;;  %1893 = vmatprep.subr.bf16.mxu1 %v2197_v3  ;;  %v2447_v29 = vshrl.u32 %v820_v28, 7  ;;  %v823_v30 = vand.u32 127, %v820_v28  ;;  %v2458_v45 = vld [vmem:[%s574_s22] sm:$0x3f]  ;;  %s2203_s21 = smov 124   ;;  %s2204_s23 = smov 108  }
  0x3b   : > { %1885 = vmatprep.subr.bf16.mxu0 %v2197_v3  ;;  %1887 = vmatprep.mubr.msk.bf16.mxu0 %vm2198_vm2, %v2197_v3  ;;  %s2205_s27 = smov 100   ;;  %s2665_s22 = sld [smem:[#allocation22_spill]]  ;;  %vm1394_vm10 = vcmask 162816   ;;  %vm1396_vm11 = vcmask 195584   ;;  %vm1398_vm12 = vcmask 228352   ;;  %vm1509_vm13 = vcmask 523264  }
  0x3c   : > { %v2417_v7 = vld [vmem:[%s2404_s1] sm:$0xff]  ;;  %vm824_vm5 = vcmp.gt.s32.totalorder %v823_v30, %v2447_v29  ;;  %v960_v44 = vsub.s32 2, %v2447_v29  ;;  %v965_v46 = vsub.s32 3, %v2447_v29  ;;  %s2206_s15 = smov 8   ;;  %s2207_s24 = smov 16  }
  0x3d   : > { %v594_v8 = vpack.c.bf16 %v2417_v7, %v2417_v7  ;;  %1894 = vmatpush3.bf16.msra.mxu1 %v2083_v5  ;;  %v944_v9 = vsel %vm612_vm3, %v2417_v7, 0.0  ;;  %v593_v31 = vld [vmem:[#allocation2] sm:$0xff]  ;;  %v972_v30 = vld [vmem:[%s2380_s30 + $0xc] sm:$0xf]  ;;  %s2209_s28 = smov 4   ;;  %s2210_s12 = smov 12  }
  0x3e   : > { %1886 = vmatpush3.bf16.msra.mxu0 %v2084_v6  ;;  %1907 = vmatprep.subr.bf16.mxu1 %v2197_v3  ;;  %v961_v47 = vrot.slane %v2458_v45, %v960_v44  ;;  %v966_v49 = vrot.slane %v2458_v45, %v965_v46  ;;  %s2211_s13 = smov 20   ;;  %s2212_s2 = smov 28  }
  0x3f   : > { %1899 = vmatprep.subr.bf16.mxu0 %v2197_v3  ;;  %945 = vadd.xlane.f32.xlu1 %v944_v9 }
  0x40   : > { %1896 = vmatmul.mubr.msk.bf16.vlgmr.msra.gmra.mxu1 %vm612_vm3, %v594_v8 }
  0x41   : > { %1888 = vmatmul.mubr.msk.bf16.vlgmr.msra.gmra.mxu0 %vm612_vm3, %v594_v8  ;;  %1909 = vmatprep.mubr.msk.bf16.mxu1 %vm2198_vm2, %v2197_v3  ;;  %s2666_s14 = scalar_lea.vmem %s2665_s22, %s2370_s25 }
  0x42   : > { %1903 = vmatprep.mubr.msk.bf16.mxu0 %vm2198_vm2, %v2197_v3  ;;  %1900 = vmatpush3.bf16.msra.mxu0 %v2085_v22  ;;  %v2087_v1 = vld [vmem:[%s2666_s14] sm:$0xff]   ;;  %s2213_s14 = smov [#allocation3]  }
  0x43   : > { %1901 = vmatprep.subr.bf16.mxu0 %v2197_v3 }
  0x46   : > { %1902 = vmatpush3.bf16.msra.mxu0 %v2086_v24 }
  0x47   : > { %1913 = vmatprep.subr.bf16.mxu0 %v2197_v3 }
  0x49   : > { %1904 = vmatmul.mubr.msk.bf16.vlgmr.msra.gmra.mxu0 %vm612_vm3, %v594_v8 }
  0x4a   : > { %1915 = vmatprep.mubr.msk.bf16.mxu0 %vm2198_vm2, %v2197_v3 }
  0xc8   : > { %v946_v21 = vpop.xlane.xlu1 %945 }
  0xc9   : > { %v948_v23 = vmul.f32 0.03125, %v946_v21 }
  0xcb   : > { %v949_v25 = vsub.f32 %v2417_v7, %v948_v23 }
  0xcd   : > { %v950_v26 = vmul.f32 %v949_v25, %v949_v25 }
  0xcf   : > { %v951_v27 = vsel %vm612_vm3, %v950_v26, 0.0 }
  0xd0   : > { %952 = vadd.xlane.f32.xlu1 %v951_v27  ;;  %v970_v27 = vld [vmem:[%s2380_s30 + $0x4] sm:$0xf] }
 0x100   : > { %v706_v10 = vpop.f32.mrf.mxu1 }
 0x101   : > { %v769_v11 = vpack.c.bf16 %v706_v10, %v706_v10  ;;  %v650_v12 = vpop.f32.mrf.mxu0  ;;  %v969_v10 = vld [vmem:[%s2380_s30] sm:$0xf] }
 0x102   : > { %v1897_v13 = vpop.f32.mrf.mxu1  ;;  %v768_v19 = vpack.c.bf16 %v650_v12, %v650_v12 }
 0x103   : > { %v776_v14 = vsel %vm771_vm4, %v769_v11, 0  ;;  %v1889_v15 = vpop.f32.mrf.mxu0 }
 0x104   : > { %v709_v16 = vpop.f32.mrf.mxu1  ;;  %1908 = vmatpush3.bf16.xpose.msra.mxu1 %v776_v14  ;;  %v971_v14 = vld [vmem:[%s2380_s30 + $0x8] sm:$0xf] }
 0x105   : > { %v653_v17 = vpop.f32.mrf.mxu0  ;;  %1919 = vmatprep.subr.bf16.mxu1 %v2197_v3 }
 0x106   : > { %v1898_v18 = vpop.f32.mrf.mxu1  ;;  %v973_v17 = vld [vmem:[%s2380_s30 + $0x10] sm:$0xf] }
 0x107   : > { %v1890_v20 = vpop.f32.mrf.mxu0 }
 0x109   : > { %v762_v59 = vpop.f32.mrf.mxu0 }
 0x10a   : > { %v770_v60 = vpack.c.bf16 %v762_v59, %v762_v59 }
 0x10b   : > { %1910 = vmatmul.mubr.msk.bf16.vlgmr.msra.gmra.mxu1 %vm771_vm4, %v768_v19  ;;  %v1905_v61 = vpop.f32.mrf.mxu0  ;;  %v975_v19 = vld [vmem:[%s2380_s30 + $0x18] sm:$0xf] }
 0x10c   : > { %1921 = vmatprep.mubr.msk.bf16.mxu1 %vm2198_vm2, %v2197_v3  ;;  %v846_v62 = vsel %vm844_vm7, %v770_v60, 0  ;;  %1920 = vmatpush3.bf16.msra.mxu1 %v2087_v1  ;;  %v2088_v1 = vld [vmem:[%s2385_s11 + $0x8] sm:$0xff]  }
 0x10d   : > { %v765_v63 = vpop.f32.mrf.mxu0  ;;  %1914 = vmatpush3.bf16.msra.mxu0 %v846_v62  ;;  %1931 = vmatprep.subr.bf16.mxu1 %v2197_v3 }
 0x10e   : > { %1925 = vmatprep.subr.bf16.mxu0 %v2197_v3 }
 0x10f   : > { %v1906_v0 = vpop.f32.mrf.mxu0 }
 0x159   : > { %v953_v41 = vpop.xlane.xlu1 %952 }
 0x15a   : > { %v954_v42 = vmul.f32 0.03125, %v953_v41 }
 0x15c   : > { %v955_v43 = vadd.f32 1e-05, %v954_v42 }
 0x15e   : > { %2094 = vrsqrt.f32 %v955_v43 }
 0x16b   : > { %v2095_v48 = vpop.eup %2094 }
 0x16c   : > { %v957_v50 = vmul.f32 %v2095_v48, %v949_v25 }
 0x16e   : > { %v962_v51 = vmul.f32 %v961_v47, %v957_v50 }
 0x170   : > { %v967_v52 = vadd.f32 %v966_v49, %v962_v51 }
 0x172   : > { %v968_v53 = vpack.c.bf16 %v967_v52, %v967_v52 }
 0x174   : > { %1072 = vrot.lane.b32.xlu1 %v968_v53, %s2199_s17  ;;  %v981_v9 = vsel %vm844_vm7, %v968_v53, 0 }
 0x178   : > { %1120 = vrot.lane.b32.xlu1 %v968_v53, %s2200_s18  ;;  %s1592_s18 = sshll.u32 %s2404_s1, 4  ;;  %s1593_s18 = int_to_ptr.vmem [resolvable:$true] %s1592_s18 }
 0x179   : > { %s2102_s22 = scalar_lea.vmem %s1593_s18, 128 }
 0x17a   : > { %p2103_p1 = scmp.ne.s32.totalorder %s1593_s18, %s2102_s22 }
 0x17c   : > { %1168 = vrot.lane.b32.xlu1 %v968_v53, %s2201_s19  ;;  %p2104_p2 = pnand %p2103_p1, %p2323_p3 }
 0x17e   : > { %p2105_p4 = pneg %p2104_p2 }
 0x180   : > { %1264 = vrot.lane.b32.xlu1 %v968_v53, %s2202_s20 }
 0x1cb   : > { %v812_v32 = vpop.f32.mrf.mxu1 }
 0x1cc   : > { %v818_v33 = vmul.f32 0.25, %v812_v32 }
 0x1cd   : > { %v1911_v34 = vpop.f32.mrf.mxu1 }
 0x1ce   : > { %v819_v35 = vadd.f32 %v818_v33, %v593_v31  ;;  %v974_v34 = vld [vmem:[%s2380_s30 + $0x14] sm:$0xf] }
 0x1cf   : > { %v815_v36 = vpop.f32.mrf.mxu1 }
 0x1d0   : > { %v828_v37 = vsel %vm824_vm5, -3.4028235e+38, %v819_v35  ;;  %v825_v38 = vsel %vm824_vm5, 0.0, %v819_v35  ;;  %v976_v36 = vld [vmem:[%s2380_s30 + $0x1c] sm:$0xf]  ;;  %s2208_s30 = smov 24  }
 0x1d1   : > { %v1912_v39 = vpop.f32.mrf.mxu1  ;;  %v829_v40 = vsel %vm826_vm6, %v828_v37, -inf  ;;  %827 = vst.msk [vmem:[#allocation2] sm:$0xff] %vm826_vm6, %v825_v38 }
 0x1d2   : > { %830 = vmax.xlane.f32.xlu0 %v829_v40 }
 0x1e6   : > { %v1073_v8 = vpop.permute.xlu1 %1072 }
 0x1e7   : > { %v1078_v12 = vsel %vm844_vm7, %v1073_v8, 0 }
 0x1ea   : > { %v1121_v11 = vpop.permute.xlu1 %1120 }
 0x1eb   : > { %v1126_v28 = vsel %vm844_vm7, %v1121_v11, 0  ;;  %v2091_v11 = vld [vmem:[%s2390_s3 + $0x10] sm:$0xff]  }
 0x1ee   : > { %v1169_v13 = vpop.permute.xlu1 %1168 }
 0x1ef   : > { %v1174_v15 = vsel %vm844_vm7, %v1169_v13, 0 }
 0x1f2   : > { %v1265_v16 = vpop.permute.xlu1 %1264 }
 0x1f3   : > { %v1270_v18 = vsel %vm844_vm7, %v1265_v16, 0 }
 0x25b   : > { %v831_v54 = vpop.xlane.xlu0 %830 }
 0x25c   : > { %v832_v55 = vsub.f32 %v828_v37, %v831_v54 }
 0x25e   : > { %v833_v56 = vmul.f32 1.442695, %v832_v55 }
 0x260   : > { %2096 = vpow2.f32 %v833_v56 }
 0x26d   : > { %v2097_v57 = vpop.eup %2096 }
 0x26e   : > { %v835_v58 = vsel %vm826_vm6, %v2097_v57, 0.0 }
 0x26f   : > { %836 = vadd.xlane.f32.xlu0 %v835_v58 }
 0x285   : > { %1024 = vrot.lane.b32.xlu0 %v968_v53, %s2203_s21  ;;  %s2670_s21 = sld [smem:[#allocation24_spill]] }
 0x289   : > { %1216 = vrot.lane.b32.xlu0 %v968_v53, %s2204_s23 }
 0x28d   : > { %1312 = vrot.lane.b32.xlu0 %v968_v53, %s2205_s27  ;;  %s2671_s27 = smov %s2670_s21 }
 0x2f8   : > { %v837_v2 = vpop.xlane.xlu0 %836 }
 0x2f9   : > { %2098 = vrcp.f32 %v837_v2 }
 0x2fc   : > { %v1025_v22 = vpop.permute.xlu0 %1024 }
 0x2fd   : > { %v1030_v24 = vsel %vm844_vm7, %v1025_v22, 0 }
 0x300   : > { %v1217_v31 = vpop.permute.xlu0 %1216 }
 0x301   : > { %v1222_v32 = vsel %vm844_vm7, %v1217_v31, 0 }
 0x304   : > { %v1313_v33 = vpop.permute.xlu0 %1312 }
 0x305   : > { %v1318_v35 = vsel %vm844_vm7, %v1313_v33, 0 }
 0x306   : > { %v2099_v4 = vpop.eup %2098 }
 0x307   : > { %v839_v5 = vmul.f32 %v2099_v4, %v2097_v57 }
 0x309   : > { %v840_v6 = vpack.c.bf16 %v839_v5, %v839_v5  ;;  %v2089_v5 = vld [vmem:[%s2385_s11] sm:$0xff]  }
 0x30b   : > { %1916 = vmatmul.mubr.msk.bf16.vlgmr.msra.gmra.mxu0 %vm826_vm6, %v840_v6 }
 0x30c   : > { %1926 = vmatpush3.bf16.msra.mxu0 %v981_v9  ;;  %1927 = vmatprep.mubr.msk.bf16.mxu0 %vm2198_vm2, %v2197_v3  ;;  %v2090_v9 = vld [vmem:[%s2390_s3 + $0x18] sm:$0xff]  }
 0x30d   : > { %1937 = vmatprep.subr.bf16.mxu0 %v2197_v3 }
 0x313   : > { %1928 = vmatmul.mubr.msk.bf16.vlgmr.msra.gmra.mxu0 %vm826_vm6, %v969_v10 }
 0x314   : > { %1938 = vmatpush3.bf16.msra.mxu0 %v1078_v12  ;;  %1939 = vmatprep.mubr.msk.bf16.mxu0 %vm2198_vm2, %v2197_v3 }
 0x315   : > { %1949 = vmatprep.subr.bf16.mxu0 %v2197_v3 }
 0x31b   : > { %1940 = vmatmul.mubr.msk.bf16.vlgmr.msra.gmra.mxu0 %vm826_vm6, %v971_v14 }
 0x31c   : > { %1950 = vmatpush3.bf16.msra.mxu0 %v1174_v15  ;;  %1951 = vmatprep.mubr.msk.bf16.mxu0 %vm2198_vm2, %v2197_v3 }
 0x31d   : > { %1961 = vmatprep.subr.bf16.mxu0 %v2197_v3 }
 0x323   : > { %1952 = vmatmul.mubr.msk.bf16.vlgmr.msra.gmra.mxu0 %vm826_vm6, %v973_v17 }
 0x324   : > { %1962 = vmatpush3.bf16.msra.mxu0 %v1270_v18  ;;  %1963 = vmatprep.mubr.msk.bf16.mxu0 %vm2198_vm2, %v2197_v3 }
 0x325   : > { %1973 = vmatprep.subr.bf16.mxu0 %v2197_v3 }
 0x32b   : > { %1964 = vmatmul.mubr.msk.bf16.vlgmr.msra.gmra.mxu0 %vm826_vm6, %v975_v19 }
 0x32c   : > { %1977 = vmatprep.mubr.msk.bf16.mxu0 %vm2198_vm2, %v2197_v3  ;;  %1974 = vmatpush3.bf16.msra.mxu0 %v2088_v1  ;;  %v1569_v1 = vsub.s32 4, %v2447_v29 }
 0x32d   : > { %1975 = vmatprep.subr.bf16.mxu0 %v2197_v3 }
 0x330   : > { %1976 = vmatpush3.bf16.msra.mxu0 %v2089_v5 }
 0x3cb   : > { %v882_v20 = vpop.f32.mrf.mxu0 }
 0x3cc   : > { %v888_v21 = vpack.c.bf16 %v882_v20, %v882_v20 }
 0x3cd   : > { %v1917_v23 = vpop.f32.mrf.mxu0 }
 0x3ce   : > { %1922 = vmatmul.mubr.msk.bf16.vlgmr.msra.gmra.mxu1 %vm771_vm4, %v888_v21  ;;  %v893_v23 = vsub.s32 0, %v2447_v29 }
 0x3cf   : > { %1932 = vmatpush3.bf16.msra.mxu1 %v1030_v24  ;;  %v885_v25 = vpop.f32.mrf.mxu0  ;;  %1933 = vmatprep.mubr.msk.bf16.mxu1 %vm2198_vm2, %v2197_v3 }
 0x3d0   : > { %1943 = vmatprep.subr.bf16.mxu1 %v2197_v3 }
 0x3d1   : > { %v1918_v26 = vpop.f32.mrf.mxu0 }
 0x3d3   : > { %v2526_v37 = vpop.f32.mrf.mxu0 }
 0x3d5   : > { %v1929_v38 = vpop.f32.mrf.mxu0 }
 0x3d6   : > { %1934 = vmatmul.mubr.msk.bf16.vlgmr.msra.gmra.mxu1 %vm826_vm6, %v970_v27 }
 0x3d7   : > { %1944 = vmatpush3.bf16.msra.mxu1 %v1126_v28  ;;  %1945 = vmatprep.mubr.msk.bf16.mxu1 %vm2198_vm2, %v2197_v3  ;;  %v1020_v39 = vpop.f32.mrf.mxu0  ;;  %v894_v28 = vrot.slane %v2458_v45, %v893_v23 }
 0x3d8   : > { %1955 = vmatprep.subr.bf16.mxu1 %v2197_v3  ;;  %v2092_v39 = vld [vmem:[%s2390_s3 + $0x8] sm:$0xff]  }
 0x3d9   : > { %v1930_v40 = vpop.f32.mrf.mxu0 }
 0x3da   : > { %v2093_v40 = vld [vmem:[%s2390_s3] sm:$0xff]   ;;  %s2667_s3 = sld [smem:[#allocation9_spill]] }
 0x3db   : > { %v1114_v41 = vpop.f32.mrf.mxu0 }
 0x3dc   : > { %1365 = vrot.lane.b32.xlu0 %v1114_v41, %s2206_s15  ;;  %v1824_v41 = vld [vmem:[%s577_s0] ss:$0 sm:$0xff]  ;;  %s2106_s15 = sshll.u32 %s2213_s14, 4  ;;  %s2107_s15 = int_to_ptr.vmem [resolvable:$false] %s2106_s15 }
 0x3dd   : > { %v1941_v42 = vpop.f32.mrf.mxu0  ;;  %p2109_p5 = scmp.lt.s32.totalorder %s1593_s18, %s2107_s15 }
 0x3de   : > { %1946 = vmatmul.mubr.msk.bf16.vlgmr.msra.gmra.mxu1 %vm826_vm6, %v972_v30  ;;  %v1400_v30 = vld [vmem:[%s581_s4] sm:$0xff]  ;;  %s2668_s4 = sld [smem:[#allocation7_spill]] }
 0x3df   : > { %1956 = vmatpush3.bf16.msra.mxu1 %v1222_v32  ;;  %1957 = vmatprep.mubr.msk.bf16.mxu1 %vm2198_vm2, %v2197_v3  ;;  %v1117_v43 = vpop.f32.mrf.mxu0 }
 0x3e0   : > { %1967 = vmatprep.subr.bf16.mxu1 %v2197_v3  ;;  %s1834_s0 = sshll.u32 %s2667_s3, 7 }
 0x3e1   : > { %v1942_v44 = vpop.f32.mrf.mxu0  ;;  %s1590_s23 = scalar_lea.hbm %s2670_s21, %s1834_s0 }
 0x3e3   : > { %v1210_v46 = vpop.f32.mrf.mxu0 }
 0x3e4   : > { %1373 = vrot.lane.b32.xlu0 %v1210_v46, %s2207_s24  ;;  %s2672_s29 = sand.u32 1, %s2668_s4   ;;  %s2108_s24 = scalar_lea.vmem %s2107_s15, 256 }
 0x3e5   : > { %v1953_v47 = vpop.f32.mrf.mxu0  ;;  %s1579_s16 = scalar_lea.sflag [#allocation4], %s2672_s29  ;;  %p2110_p6 = scmp.lt.s32.totalorder %s2108_s24, %s2102_s22 }
 0x3e6   : > { %1958 = vmatmul.mubr.msk.bf16.vlgmr.msra.gmra.mxu1 %vm826_vm6, %v974_v34 }
 0x3e7   : > { %1968 = vmatpush3.bf16.msra.mxu1 %v1318_v35  ;;  %1969 = vmatprep.mubr.msk.bf16.mxu1 %vm2198_vm2, %v2197_v3  ;;  %v1213_v48 = vpop.f32.mrf.mxu0  ;;  %p2111_p7 = por %p2110_p6, %p2109_p5 }
 0x3e8   : > { %1981 = vmatprep.subr.bf16.mxu1 %v2197_v3 }
 0x3e9   : > { %v1954_v49 = vpop.f32.mrf.mxu0  ;;  %p2112_p8 = pnand %p2111_p7, %p2105_p4 }
 0x3ea   : > { %v1483_v49 = vsub.s32 1, %v2447_v29 }
 0x3eb   : > { %v1306_v50 = vpop.f32.mrf.mxu0 }
 0x3ec   : > { %1381 = vrot.lane.b32.xlu0 %v1306_v50, %s2208_s30 }
 0x3ed   : > { %v1965_v51 = vpop.f32.mrf.mxu0 }
 0x3ee   : > { %1970 = vmatmul.mubr.msk.bf16.vlgmr.msra.gmra.mxu1 %vm826_vm6, %v976_v36 }
 0x3ef   : > { %1989 = vmatprep.mubr.msk.bf16.mxu1 %vm2198_vm2, %v2197_v3  ;;  %v1309_v52 = vpop.f32.mrf.mxu0  ;;  %1982 = vmatpush3.bf16.msra.mxu1 %v2090_v9 }
 0x3f0   : > { %1983 = vmatprep.subr.bf16.mxu1 %v2197_v3 }
 0x3f1   : > { %v1966_v53 = vpop.f32.mrf.mxu0 }
 0x3f3   : > { %1984 = vmatpush3.bf16.msra.mxu1 %v2091_v11 }
 0x3f4   : > { %1985 = vmatprep.subr.bf16.mxu1 %v2197_v3 }
 0x3f7   : > { %1986 = vmatpush3.bf16.msra.mxu1 %v2092_v39 }
 0x3f8   : > { %1987 = vmatprep.subr.bf16.mxu1 %v2197_v3  ;;  %v1484_v3 = vrot.slane %v2458_v45, %v1483_v49 }
 0x3fb   : > { %1988 = vmatpush3.bf16.msra.mxu1 %v2093_v40 }
 0x44e   : > { %v1366_v18 = vpop.permute.xlu0 %1365 }
 0x456   : > { %v1374_v22 = vpop.permute.xlu0 %1373 }
 0x45e   : > { %v1382_v27 = vpop.permute.xlu0 %1381 }
 0x48e   : > { %v938_v54 = vpop.f32.mrf.mxu1 }
 0x48f   : > { %v939_v34 = vadd.f32 %v938_v54, %v894_v28 }
 0x490   : > { %v1923_v55 = vpop.f32.mrf.mxu1 }
 0x492   : > { %v941_v56 = vpop.f32.mrf.mxu1 }
 0x494   : > { %v1924_v57 = vpop.f32.mrf.mxu1 }
 0x496   : > { %v1066_v58 = vpop.f32.mrf.mxu1 }
 0x497   : > { %1361 = vrot.lane.b32.xlu1 %v1066_v58, %s2209_s28 }
 0x498   : > { %v1935_v59 = vpop.f32.mrf.mxu1 }
 0x49a   : > { %v1069_v60 = vpop.f32.mrf.mxu1 }
 0x49c   : > { %v1936_v61 = vpop.f32.mrf.mxu1 }
 0x49e   : > { %v1162_v62 = vpop.f32.mrf.mxu1 }
 0x49f   : > { %1369 = vrot.lane.b32.xlu1 %v1162_v62, %s2210_s12 }
 0x4a0   : > { %v1947_v63 = vpop.f32.mrf.mxu1 }
 0x4a2   : > { %v1165_v0 = vpop.f32.mrf.mxu1 }
 0x4a4   : > { %v1948_v2 = vpop.f32.mrf.mxu1 }
 0x4a5   : > { %v1574_v2 = vsub.s32 5, %v2447_v29 }
 0x4a6   : > { %v1258_v4 = vpop.f32.mrf.mxu1 }
 0x4a7   : > { %1377 = vrot.lane.b32.xlu1 %v1258_v4, %s2211_s13  ;;  %v1570_v4 = vrot.slane %v2458_v45, %v1569_v1 }
 0x4a8   : > { %v1959_v6 = vpop.f32.mrf.mxu1 }
 0x4aa   : > { %v1261_v8 = vpop.f32.mrf.mxu1 }
 0x4ab   : > { %v1575_v8 = vrot.slane %v2458_v45, %v1574_v2 }
 0x4ac   : > { %v1960_v10 = vpop.f32.mrf.mxu1 }
 0x4ae   : > { %v1354_v12 = vpop.f32.mrf.mxu1 }
 0x4af   : > { %1385 = vrot.lane.b32.xlu1 %v1354_v12, %s2212_s2 }
 0x4b0   : > { %v1971_v13 = vpop.f32.mrf.mxu1 }
 0x4b2   : > { %v1357_v14 = vpop.f32.mrf.mxu1 }
 0x4b4   : > { %v1972_v15 = vpop.f32.mrf.mxu1 }
 0x509   : > { %v1362_v16 = vpop.permute.xlu1 %1361 }
 0x50a   : > { %v1389_v17 = vsel %vm1388_vm8, %v2526_v37, %v1362_v16 }
 0x50b   : > { %v1390_v20 = vsel %vm826_vm6, %v1389_v17, %v1366_v18 }
 0x511   : > { %v1370_v19 = vpop.permute.xlu1 %1369 }
 0x512   : > { %v1392_v21 = vsel %vm1391_vm9, %v1390_v20, %v1370_v19 }
 0x513   : > { %v1393_v25 = vsel %vm771_vm4, %v1392_v21, %v1374_v22 }
 0x519   : > { %v1378_v24 = vpop.permute.xlu1 %1377 }
 0x51a   : > { %v1395_v26 = vsel %vm1394_vm10, %v1393_v25, %v1378_v24 }
 0x51b   : > { %v1397_v31 = vsel %vm1396_vm11, %v1395_v26, %v1382_v27 }
 0x521   : > { %v1386_v32 = vpop.permute.xlu1 %1385 }
 0x522   : > { %v1399_v33 = vsel %vm1398_vm12, %v1397_v31, %v1386_v32 }
 0x523   : > { %v1401_v35 = vadd.f32 %v1400_v30, %v1399_v33 }
 0x525   : > { %v1402_v36 = vadd.f32 %v1401_v35, %v939_v34 }
 0x527   : > { %v1403_v37 = vmul.f32 %v1402_v36, %v2417_v7 }
 0x529   : > { %v1404_v38 = vpack.c.bf16 %v1403_v37, %v1403_v37 }
 0x52b   : > { %1978 = vmatmul.mubr.msk.bf16.vlgmr.msra.gmra.mxu0 %vm612_vm3, %v1404_v38 }
 0x5eb   : > { %v1465_v42 = vpop.f32.mrf.mxu0 }
 0x5ec   : > { %v1466_v43 = vadd.f32 %v1824_v41, %v1465_v42 }
 0x5ed   : > { %v1979_v44 = vpop.f32.mrf.mxu0 }
 0x5ee   : > { %v1471_v46 = vmax.f32 %v1466_v43, 0.0 }
 0x5ef   : > { %v1468_v47 = vpop.f32.mrf.mxu0 }
 0x5f0   : > { %v1472_v7 = vpack.c.bf16 %v1471_v46, %v1471_v46 }
 0x5f1   : > { %v1980_v48 = vpop.f32.mrf.mxu0 }
 0x5f2   : > { %1990 = vmatmul.mubr.msk.bf16.vlgmr.msra.gmra.mxu1 %vm1509_vm13, %v1472_v7 }
 0x6b2   : > { %v1547_v50 = vpop.f32.mrf.mxu1 }
 0x6b3   : > { %v1548_v51 = vadd.f32 %v1547_v50, %v1484_v3 }
 0x6b4   : > { %v1991_v52 = vpop.f32.mrf.mxu1 }
 0x6b5   : > { %v1553_v53 = vadd.f32 %v1548_v51, %v1403_v37 }
 0x6b6   : > { %v1550_v54 = vpop.f32.mrf.mxu1 }
 0x6b7   : > { %v1554_v55 = vsel %vm612_vm3, %v1553_v53, 0.0 }
 0x6b8   : > { %1555 = vadd.xlane.f32.xlu0 %v1554_v55  ;;  %v1992_v56 = vpop.f32.mrf.mxu1 }
 0x741   : > { %v1556_v57 = vpop.xlane.xlu0 %1555 }
 0x742   : > { %v1557_v58 = vmul.f32 0.03125, %v1556_v57 }
 0x744   : > { %v1558_v59 = vsub.f32 %v1553_v53, %v1557_v58 }
 0x746   : > { %v1559_v60 = vmul.f32 %v1558_v59, %v1558_v59 }
 0x748   : > { %v1560_v61 = vsel %vm612_vm3, %v1559_v60, 0.0 }
 0x749   : > { %1561 = vadd.xlane.f32.xlu1 %v1560_v61 }
 0x7d2   : > { %v1562_v62 = vpop.xlane.xlu1 %1561 }
 0x7d3   : > { %v1563_v63 = vmul.f32 0.03125, %v1562_v62 }
 0x7d5   : > { %v1564_v0 = vadd.f32 1e-05, %v1563_v63 }
 0x7d7   : > { %2100 = vrsqrt.f32 %v1564_v0 }
 0x7e4   : > { %v2101_v5 = vpop.eup %2100 }
 0x7e5   : > { %v1566_v6 = vmul.f32 %v2101_v5, %v1558_v59 }
 0x7e7   : > { %v1571_v9 = vmul.f32 %v1570_v4, %v1566_v6 }
 0x7e9   : > { %v1576_v10 = vadd.f32 %v1575_v8, %v1571_v9 }
 0x7eb   : > { %1577 = vst.msk [vmem:[%s2404_s1] sm:$0xff] %vm612_vm3, %v1576_v10 }
 0x7ec   : > { %2115 = shalt.err (!%p2112_p8)
}
 0x7ed   : > { %s2116_s30 = scalar_lea.hbm %s1590_s23, 128  ;;  %s2120_s12 = scalar_lea.hbm %s2671_s27, 256 }
 0x7ee   : > { %p2117_p10 = scmp.ne.s32.totalorder %s1590_s23, %s2116_s30  ;;  %p2121_p13 = scmp.lt.s32.totalorder %s1590_s23, %s2671_s27 }
 0x7ef   : > { %p2122_p0 = scmp.lt.s32.totalorder %s2120_s12, %s2116_s30 }
 0x7f0   : > { %p2118_p11 = pnand %p2117_p10, %p2323_p3 }
 0x7f1   : > { %p2123_p1 = por %p2122_p0, %p2121_p13 }
 0x7f2   : > { %p2119_p12 = pneg %p2118_p11 }
 0x7f4   : > { %p2124_p2 = pnand %p2123_p1, %p2119_p12 }
 0x7f6   : > { %2127 = shalt.err (!%p2124_p2)
}
 0x7f7   : > { %1993 = dma.vmem_to_hbm [thread:$0]  (%p2323_p3), %s1593_s18, 128, %s1590_s23, %s1579_s16  }
 0x7f8 PF: > { %s2673_s11 = sld [smem:[#allocation12_spill]] }
 0x7f9   : > { %s2674_s5 = sld [smem:[#allocation6_spill]] }
 0x7fe   : > { %p1999_p4 = scmp.ge.s32.totalorder %s2673_s11, 2 }
 0x7ff   : > { %s1604_s17 = sand.u32 1, %s2674_s5  }
 0x800   : > { %p1996_p5 = pnand %p1999_p4, %p2333_p9  ;;  %s1605_s3 = scalar_lea.sflag [#allocation4], %s1604_s17 }
 0x802   : > { %p1997_p6 = pneg %p1996_p5 }
 0x804   : > { %2161 = dma.done.wait (%p1997_p6), %s1605_s3, 128  }
 0x805   : > { %2163 = vsyncadd (%p1997_p6), %s1605_s3, 4294967168  ;;  %s24_s24 = sadd.s32 1, %s2673_s11   ;;  %s2676_s17 = sld [smem:[#allocation7_spill]] }
 0x806   : > { %p21_p7 = scmp.ge.s32.totalorder %s24_s24, 6   ;;  %s2677_s18 = sld [smem:[#allocation8_spill]] }
 0x807   : > { %s2678_s19 = sld [smem:[#allocation17_spill]] }
 0x808   : > { %s2679_s20 = sld [smem:[#allocation10_spill]]  ;;  %23 = sbr.rel (!%p21_p7) target bundleno = 13 (0xd), region = 133 }
 0x809   : > { %s2680_s21 = sld [smem:[#allocation11_spill]] }
 0x80a   : > { %s2681_s22 = sld [smem:[#allocation13_spill]] }
 0x80b   : > { %s2682_s23 = sld [smem:[#allocation15_spill]] }
 0x80d   :  { %1610 = vsyncpa [#allocation4], 1 }
 0x80e   :  { %1612 = vsyncpa [#allocation4 + $0x1], 1 }

</bundles_post_ra>
